<compile_context>
chip_gen: v7x
topology: tpu7x:2x2x1
jax: 0.10.0
libtpu: 0.0.40
codegen_flags: <defaults>
</compile_context>

<pallas_src>
import jax
import jax.numpy as jnp
from jax.experimental import pallas as pl
from jax.experimental.pallas import tpu as pltpu


def _qcnet_loss_kernel(gt_x_ref, gt_y_ref, mask_ref,
                       l1x_ref, l1y_ref, s1x_ref, s1y_ref,
                       l2x_ref, l2y_ref, s2x_ref, s2y_ref,
                       scores_ref, out_ref):
    f32 = jnp.float32
    gt_x = gt_x_ref[...].astype(f32)          # [N, FT]
    gt_y = gt_y_ref[...].astype(f32)
    mask = mask_ref[...].astype(f32)          # [N, FT] (0/1)

    K = l1x_ref.shape[0]
    N, FT = gt_x.shape

    # ---- pass 1: best mode by masked stage-1 L2 distance ([N,1] partials only)
    def _mode_scan(k, carry):
        best_val, best_idx = carry
        dx = l1x_ref[k].astype(f32) - gt_x
        dy = l1y_ref[k].astype(f32) - gt_y
        l2n = jnp.sum(jnp.sqrt(dx * dx + dy * dy) * mask, axis=-1, keepdims=True)
        better = l2n < best_val               # strict '<' keeps the first argmin
        return (jnp.where(better, l2n, best_val),
                jnp.where(better, k, best_idx))

    _, best_idx = jax.lax.fori_loop(
        0, K, _mode_scan,
        (jnp.full((N, 1), jnp.inf, f32), jnp.zeros((N, 1), jnp.int32)),
        unroll=True)

    # ---- pass 2 (per stage): gather the best-mode tensors with cheap VPU
    #      selects, then evaluate the Laplace NLL exactly once.
    def _best_mode_nll_tsum(lx_ref, ly_ref, sx_ref, sy_ref):
        def _gather(k, carry):
            lx, ly, sx, sy = carry
            sel = best_idx == k               # [N, 1]
            return (jnp.where(sel, lx_ref[k].astype(f32), lx),
                    jnp.where(sel, ly_ref[k].astype(f32), ly),
                    jnp.where(sel, sx_ref[k].astype(f32), sx),
                    jnp.where(sel, sy_ref[k].astype(f32), sy))

        zeros = jnp.zeros((N, FT), f32)
        ones = jnp.ones((N, FT), f32)
        lx, ly, sx, sy = jax.lax.fori_loop(0, K, _gather,
                                           (zeros, zeros, ones, ones),
                                           unroll=True)
        # log(2*sx) + log(2*sy) fused into a single EUP log.
        nll = (jnp.log(4.0 * sx * sy) +
               jnp.abs(gt_x - lx) / sx + jnp.abs(gt_y - ly) / sy)   # [N, FT]
        return jnp.sum(nll * mask, axis=-1, keepdims=True)          # [N, 1]

    nll1_tsum = _best_mode_nll_tsum(l1x_ref, l1y_ref, s1x_ref, s1y_ref)
    nll2_tsum = _best_mode_nll_tsum(l2x_ref, l2y_ref, s2x_ref, s2y_ref)

    # ---- per-batch regression partial losses -------------------------------
    denom_t = jnp.maximum(jnp.sum(mask, axis=-1, keepdims=True), 1.0)   # [N,1]
    ag_valid = (jnp.max(mask, axis=-1, keepdims=True) > 0.0).astype(f32)
    denom_a = jnp.maximum(jnp.sum(ag_valid), 1.0)                       # scalar
    reg1_b = jnp.sum(nll1_tsum / denom_t) / denom_a
    reg2_b = jnp.sum(nll2_tsum / denom_t) / denom_a

    # ---- classification (endpoint mixture) partials ------------------------
    last = pl.ds(FT - 1, 1)
    gt_xe = gt_x[:, FT - 1:]                  # [N, 1]
    gt_ye = gt_y[:, FT - 1:]
    cls_m = mask[:, FT - 1:]                  # [N, 1]
    l2xe = l2x_ref[:, :, last].astype(f32)    # [K, N, 1]
    l2ye = l2y_ref[:, :, last].astype(f32)
    s2xe = s2x_ref[:, :, last].astype(f32)
    s2ye = s2y_ref[:, :, last].astype(f32)

    nll_e = (jnp.log(4.0 * s2xe * s2ye) +
             jnp.abs(gt_xe[None] - l2xe) / s2xe +
             jnp.abs(gt_ye[None] - l2ye) / s2ye) * cls_m[None]      # [K, N, 1]

    scores = scores_ref[...].astype(f32)                            # [K, N, 1]
    s_max = jnp.max(scores, axis=0, keepdims=True)
    log_pis = scores - (jnp.log(jnp.sum(jnp.exp(scores - s_max),
                                        axis=0, keepdims=True)) + s_max)
    z = log_pis - nll_e
    z_max = jnp.max(z, axis=0, keepdims=True)
    mixture_nll = -(jnp.log(jnp.sum(jnp.exp(z - z_max), axis=0, keepdims=True))
                    + z_max)                                        # [1, N, 1]
    cls_sum_b = jnp.sum(mixture_nll)
    cls_cnt_b = jnp.sum(cls_m)

    # ---- write the per-batch partials into a lane-dense output row ---------
    lane = jax.lax.broadcasted_iota(jnp.int32, (8, 128), 1)
    row = (jnp.where(lane == 0, reg1_b, 0.0) +
           jnp.where(lane == 1, reg2_b, 0.0) +
           jnp.where(lane == 2, cls_sum_b, 0.0) +
           jnp.where(lane == 3, cls_cnt_b, 0.0))
    out_ref[0] = row.astype(out_ref.dtype)


def qcnet_loss(data):
    """Pallas implementation of QCNetloss.forward (same data-dict interface)."""
    reg_mask = data['agent_features']['state_valid_masks']['fut']
    gt = data['agent_features']['acs']['poses']['fut'][..., :2]
    locs1, scales1 = data['locs_stage1'], data['scales_stage1']
    locs2, scales2 = data['locs_stage2'], data['scales_stage2']
    scores = data['scores']
    B, K, N, FT, _ = locs1.shape

    # Only repack: split x/y (no transposes, no up-casts -- upcast in-kernel).
    gt_x, gt_y = gt[..., 0], gt[..., 1]                   # [B, N, FT]
    maskf = reg_mask.astype(jnp.float32)                  # [B, N, FT]

    def split_xy(a):                                      # [B,K,N,FT,2] -> 2x [B,K,N,FT]
        return a[..., 0], a[..., 1]

    l1x, l1y = split_xy(locs1)
    s1x, s1y = split_xy(scales1)
    l2x, l2y = split_xy(locs2)
    s2x, s2y = split_xy(scales2)
    scores_in = scores[..., None]                         # [B, K, N, 1]

    spec_bnf = pl.BlockSpec((None, N, FT), lambda b: (b, 0, 0))
    spec_bknf = pl.BlockSpec((None, K, N, FT), lambda b: (b, 0, 0, 0))
    spec_scores = pl.BlockSpec((None, K, N, 1), lambda b: (b, 0, 0, 0))

    partials = pl.pallas_call(
        _qcnet_loss_kernel,
        out_shape=jax.ShapeDtypeStruct((B, 8, 128), jnp.float32),
        grid=(B,),
        in_specs=[spec_bnf] * 3 + [spec_bknf] * 8 + [spec_scores],
        out_specs=pl.BlockSpec((1, 8, 128), lambda b: (b, 0, 0)),
        compiler_params=pltpu.CompilerParams(
            dimension_semantics=("parallel",),
            vmem_limit_bytes=32 * 1024 * 1024),
    )(gt_x, gt_y, maskf, l1x, l1y, s1x, s1y, l2x, l2y, s2x, s2y, scores_in)

    p = partials[:, 0, :4]                                # [B, 4] per-batch partials
    reg_propose = jnp.sum(p[:, 0]) / B
    reg_refine = jnp.sum(p[:, 1]) / B
    cls_loss = jnp.sum(p[:, 2]) / (B * jnp.sum(p[:, 3]))
    return {'reg_propose_loss': reg_propose, 'reg_refine_loss': reg_refine,
            'cls_loss': cls_loss, 'total_loss': reg_propose + reg_refine + cls_loss}


def reference_loss(data):
    """Pure-JAX reference mirroring the PyTorch module line by line."""
    reg_mask = data['agent_features']['state_valid_masks']['fut'].astype(jnp.float32)
    gt = data['agent_features']['acs']['poses']['fut'][..., :2]
    locs1, scales1 = data['locs_stage1'], data['scales_stage1']
    locs2, scales2 = data['locs_stage2'], data['scales_stage2']
    scores = data['scores']
    B, K, N, FT, H = locs1.shape

    cls_mask = reg_mask[:, :, -1]
    ag_mask = (reg_mask.max(-1) > 0).astype(jnp.float32)

    l2 = jnp.sqrt(jnp.sum((locs1 - gt[:, None]) ** 2, axis=-1))
    l2 = jnp.sum(l2 * reg_mask[:, None], axis=-1)
    best = jnp.argmin(l2, axis=1)
    idx = jnp.broadcast_to(best[:, None, :, None, None], (B, 1, N, FT, H))

    def gather(a):
        return jnp.take_along_axis(a, idx, axis=1)[:, 0]

    def nll_sum(loc, scale, x):
        return jnp.sum(jnp.log(2.0 * scale) + jnp.abs(x - loc) / scale, axis=-1)

    nll1 = nll_sum(gather(locs1), gather(scales1), gt) * reg_mask
    nll2 = nll_sum(gather(locs2), gather(scales2), gt) * reg_mask

    def reg_loss(n):
        return jnp.mean(jnp.sum(jnp.sum(n, -1) / jnp.maximum(jnp.sum(reg_mask, -1), 1.0), -1)
                        / jnp.maximum(jnp.sum(ag_mask, -1), 1.0))

    loss1, loss2 = reg_loss(nll1), reg_loss(nll2)

    nll_e = nll_sum(locs2[:, :, :, -1], scales2[:, :, :, -1], gt[:, None, :, -1]) * cls_mask[:, None]
    log_pis = jax.nn.log_softmax(scores, axis=1)
    mix = -jax.nn.logsumexp(log_pis - nll_e, axis=1)
    cls = jnp.sum(mix) / (B * jnp.sum(cls_mask))
    return {'reg_propose_loss': loss1, 'reg_refine_loss': loss2,
            'cls_loss': cls, 'total_loss': loss1 + loss2 + cls}


if __name__ == "__main__":
    key = jax.random.PRNGKey(0)
    B, K, N, FT = 2, 4, 8, 12
    ks = jax.random.split(key, 8)

    locs1 = jax.random.normal(ks[0], (B, K, N, FT, 2), jnp.float32)
    scales1 = 0.2 + jax.nn.softplus(jax.random.normal(ks[1], (B, K, N, FT, 2), jnp.float32))
    locs2 = jax.random.normal(ks[2], (B, K, N, FT, 2), jnp.float32)
    scales2 = 0.2 + jax.nn.softplus(jax.random.normal(ks[3], (B, K, N, FT, 2), jnp.float32))
    scores = jax.random.normal(ks[4], (B, K, N), jnp.float32)
    gt_fut = jax.random.normal(ks[5], (B, N, FT, 3), jnp.float32)

    lens = jax.random.randint(ks[6], (B, N), 0, FT + 1)
    lens = lens.at[:, 0].set(FT)   # ensure at least one fully-valid agent per batch
    reg_mask = (jnp.arange(FT)[None, None, :] < lens[:, :, None])

    data = {
        'agent_features': {
            'state_valid_masks': {'fut': reg_mask},
            'acs': {'poses': {'fut': gt_fut}},
        },
        'locs_stage1': locs1, 'scales_stage1': scales1,
        'locs_stage2': locs2, 'scales_stage2': scales2,
        'scores': scores,
    }

    out = qcnet_loss(data)
    jax.block_until_ready(out)

    ref = reference_loss(data)
    for name in ('reg_propose_loss', 'reg_refine_loss', 'cls_loss', 'total_loss'):
        assert jnp.allclose(out[name], ref[name], rtol=2e-3, atol=2e-3), \
            (name, float(out[name]), float(ref[name]))

    print("KERNEL_OK")
</pallas_src>

<mosaic_0001>
module attributes {stable_mosaic.version = 11 : i64} {
  func.func @_qcnet_loss_kernel(%arg0: i32, %arg1: memref<1x8x12xf32, #tpu.memory_space<vmem>>, %arg2: memref<1x8x12xf32, #tpu.memory_space<vmem>>, %arg3: memref<1x8x12xf32, #tpu.memory_space<vmem>>, %arg4: memref<1x4x8x12xf32, #tpu.memory_space<vmem>>, %arg5: memref<1x4x8x12xf32, #tpu.memory_space<vmem>>, %arg6: memref<1x4x8x12xf32, #tpu.memory_space<vmem>>, %arg7: memref<1x4x8x12xf32, #tpu.memory_space<vmem>>, %arg8: memref<1x4x8x12xf32, #tpu.memory_space<vmem>>, %arg9: memref<1x4x8x12xf32, #tpu.memory_space<vmem>>, %arg10: memref<1x4x8x12xf32, #tpu.memory_space<vmem>>, %arg11: memref<1x4x8x12xf32, #tpu.memory_space<vmem>>, %arg12: memref<1x4x8x1xf32, #tpu.memory_space<vmem>>, %arg13: memref<1x8x128xf32, #tpu.memory_space<vmem>>) attributes {dimension_semantics = [#tpu.dimension_semantics<parallel>], iteration_bounds = array<i64: 2>, scalar_prefetch = 0 : i64, scratch_operands = 0 : i64, tpu.core_type = #tpu.core_type<tc>, window_params = [{transform_indices = @transform_0, window_bounds = array<i64: 1, 8, 12>}, {transform_indices = @transform_1, window_bounds = array<i64: 1, 8, 12>}, {transform_indices = @transform_2, window_bounds = array<i64: 1, 8, 12>}, {transform_indices = @transform_3, window_bounds = array<i64: 1, 4, 8, 12>}, {transform_indices = @transform_4, window_bounds = array<i64: 1, 4, 8, 12>}, {transform_indices = @transform_5, window_bounds = array<i64: 1, 4, 8, 12>}, {transform_indices = @transform_6, window_bounds = array<i64: 1, 4, 8, 12>}, {transform_indices = @transform_7, window_bounds = array<i64: 1, 4, 8, 12>}, {transform_indices = @transform_8, window_bounds = array<i64: 1, 4, 8, 12>}, {transform_indices = @transform_9, window_bounds = array<i64: 1, 4, 8, 12>}, {transform_indices = @transform_10, window_bounds = array<i64: 1, 4, 8, 12>}, {transform_indices = @transform_11, window_bounds = array<i64: 1, 4, 8, 1>}, {transform_indices = @transform_12, window_bounds = array<i64: 1, 8, 128>}]} {
    %c0 = arith.constant 0 : index
    %c0_0 = arith.constant 0 : index
    %c0_1 = arith.constant 0 : index
    %0 = vector.load %arg1[%c0, %c0_0, %c0_1] : memref<1x8x12xf32, #tpu.memory_space<vmem>>, vector<1x8x12xf32>
    %1 = vector.shape_cast %0 : vector<1x8x12xf32> to vector<8x12xf32>
    %c0_2 = arith.constant 0 : index
    %c0_3 = arith.constant 0 : index
    %c0_4 = arith.constant 0 : index
    %2 = vector.load %arg2[%c0_2, %c0_3, %c0_4] : memref<1x8x12xf32, #tpu.memory_space<vmem>>, vector<1x8x12xf32>
    %3 = vector.shape_cast %2 : vector<1x8x12xf32> to vector<8x12xf32>
    %c0_5 = arith.constant 0 : index
    %c0_6 = arith.constant 0 : index
    %c0_7 = arith.constant 0 : index
    %4 = vector.load %arg3[%c0_5, %c0_6, %c0_7] : memref<1x8x12xf32, #tpu.memory_space<vmem>>, vector<1x8x12xf32>
    %5 = vector.shape_cast %4 : vector<1x8x12xf32> to vector<8x12xf32>
    %cst = arith.constant 0x7F800000 : f32
    %6 = vector.broadcast %cst : f32 to vector<8x1xf32>
    %c0_i32 = arith.constant 0 : i32
    %7 = vector.broadcast %c0_i32 : i32 to vector<8x1xi32>
    %c0_i32_8 = arith.constant 0 : i32
    %c0_9 = arith.constant 0 : index
    %8 = arith.index_cast %c0_i32_8 : i32 to index
    %c0_10 = arith.constant 0 : index
    %c0_11 = arith.constant 0 : index
    %9 = vector.load %arg4[%c0_9, %8, %c0_10, %c0_11] : memref<1x4x8x12xf32, #tpu.memory_space<vmem>>, vector<1x1x8x12xf32>
    %10 = vector.shape_cast %9 : vector<1x1x8x12xf32> to vector<8x12xf32>
    %11 = arith.subf %10, %1 : vector<8x12xf32>
    %c0_12 = arith.constant 0 : index
    %12 = arith.index_cast %c0_i32_8 : i32 to index
    %c0_13 = arith.constant 0 : index
    %c0_14 = arith.constant 0 : index
    %13 = vector.load %arg5[%c0_12, %12, %c0_13, %c0_14] : memref<1x4x8x12xf32, #tpu.memory_space<vmem>>, vector<1x1x8x12xf32>
    %14 = vector.shape_cast %13 : vector<1x1x8x12xf32> to vector<8x12xf32>
    %15 = arith.subf %14, %3 : vector<8x12xf32>
    %16 = arith.mulf %11, %11 : vector<8x12xf32>
    %17 = arith.mulf %15, %15 : vector<8x12xf32>
    %18 = arith.addf %16, %17 : vector<8x12xf32>
    %19 = math.sqrt %18 : vector<8x12xf32>
    %20 = arith.mulf %19, %5 : vector<8x12xf32>
    %cst_15 = arith.constant dense<0.000000e+00> : vector<8xf32>
    %21 = vector.multi_reduction <add>, %20, %cst_15 [1] : vector<8x12xf32> to vector<8xf32>
    %22 = vector.shape_cast %21 : vector<8xf32> to vector<8x1xf32>
    %23 = arith.cmpf olt, %22, %6 : vector<8x1xf32>
    %24 = arith.select %23, %22, %6 : vector<8x1xi1>, vector<8x1xf32>
    %25 = vector.broadcast %c0_i32_8 : i32 to vector<8x1xi32>
    %26 = arith.select %23, %25, %7 : vector<8x1xi1>, vector<8x1xi32>
    %c1_i32 = arith.constant 1 : i32
    %c0_16 = arith.constant 0 : index
    %27 = arith.index_cast %c1_i32 : i32 to index
    %c0_17 = arith.constant 0 : index
    %c0_18 = arith.constant 0 : index
    %28 = vector.load %arg4[%c0_16, %27, %c0_17, %c0_18] : memref<1x4x8x12xf32, #tpu.memory_space<vmem>>, vector<1x1x8x12xf32>
    %29 = vector.shape_cast %28 : vector<1x1x8x12xf32> to vector<8x12xf32>
    %30 = arith.subf %29, %1 : vector<8x12xf32>
    %c0_19 = arith.constant 0 : index
    %31 = arith.index_cast %c1_i32 : i32 to index
    %c0_20 = arith.constant 0 : index
    %c0_21 = arith.constant 0 : index
    %32 = vector.load %arg5[%c0_19, %31, %c0_20, %c0_21] : memref<1x4x8x12xf32, #tpu.memory_space<vmem>>, vector<1x1x8x12xf32>
    %33 = vector.shape_cast %32 : vector<1x1x8x12xf32> to vector<8x12xf32>
    %34 = arith.subf %33, %3 : vector<8x12xf32>
    %35 = arith.mulf %30, %30 : vector<8x12xf32>
    %36 = arith.mulf %34, %34 : vector<8x12xf32>
    %37 = arith.addf %35, %36 : vector<8x12xf32>
    %38 = math.sqrt %37 : vector<8x12xf32>
    %39 = arith.mulf %38, %5 : vector<8x12xf32>
    %cst_22 = arith.constant dense<0.000000e+00> : vector<8xf32>
    %40 = vector.multi_reduction <add>, %39, %cst_22 [1] : vector<8x12xf32> to vector<8xf32>
    %41 = vector.shape_cast %40 : vector<8xf32> to vector<8x1xf32>
    %42 = arith.cmpf olt, %41, %24 : vector<8x1xf32>
    %43 = arith.select %42, %41, %24 : vector<8x1xi1>, vector<8x1xf32>
    %44 = vector.broadcast %c1_i32 : i32 to vector<8x1xi32>
    %45 = arith.select %42, %44, %26 : vector<8x1xi1>, vector<8x1xi32>
    %c2_i32 = arith.constant 2 : i32
    %c0_23 = arith.constant 0 : index
    %46 = arith.index_cast %c2_i32 : i32 to index
    %c0_24 = arith.constant 0 : index
    %c0_25 = arith.constant 0 : index
    %47 = vector.load %arg4[%c0_23, %46, %c0_24, %c0_25] : memref<1x4x8x12xf32, #tpu.memory_space<vmem>>, vector<1x1x8x12xf32>
    %48 = vector.shape_cast %47 : vector<1x1x8x12xf32> to vector<8x12xf32>
    %49 = arith.subf %48, %1 : vector<8x12xf32>
    %c0_26 = arith.constant 0 : index
    %50 = arith.index_cast %c2_i32 : i32 to index
    %c0_27 = arith.constant 0 : index
    %c0_28 = arith.constant 0 : index
    %51 = vector.load %arg5[%c0_26, %50, %c0_27, %c0_28] : memref<1x4x8x12xf32, #tpu.memory_space<vmem>>, vector<1x1x8x12xf32>
    %52 = vector.shape_cast %51 : vector<1x1x8x12xf32> to vector<8x12xf32>
    %53 = arith.subf %52, %3 : vector<8x12xf32>
    %54 = arith.mulf %49, %49 : vector<8x12xf32>
    %55 = arith.mulf %53, %53 : vector<8x12xf32>
    %56 = arith.addf %54, %55 : vector<8x12xf32>
    %57 = math.sqrt %56 : vector<8x12xf32>
    %58 = arith.mulf %57, %5 : vector<8x12xf32>
    %cst_29 = arith.constant dense<0.000000e+00> : vector<8xf32>
    %59 = vector.multi_reduction <add>, %58, %cst_29 [1] : vector<8x12xf32> to vector<8xf32>
    %60 = vector.shape_cast %59 : vector<8xf32> to vector<8x1xf32>
    %61 = arith.cmpf olt, %60, %43 : vector<8x1xf32>
    %62 = arith.select %61, %60, %43 : vector<8x1xi1>, vector<8x1xf32>
    %63 = vector.broadcast %c2_i32 : i32 to vector<8x1xi32>
    %64 = arith.select %61, %63, %45 : vector<8x1xi1>, vector<8x1xi32>
    %c3_i32 = arith.constant 3 : i32
    %c0_30 = arith.constant 0 : index
    %65 = arith.index_cast %c3_i32 : i32 to index
    %c0_31 = arith.constant 0 : index
    %c0_32 = arith.constant 0 : index
    %66 = vector.load %arg4[%c0_30, %65, %c0_31, %c0_32] : memref<1x4x8x12xf32, #tpu.memory_space<vmem>>, vector<1x1x8x12xf32>
    %67 = vector.shape_cast %66 : vector<1x1x8x12xf32> to vector<8x12xf32>
    %68 = arith.subf %67, %1 : vector<8x12xf32>
    %c0_33 = arith.constant 0 : index
    %69 = arith.index_cast %c3_i32 : i32 to index
    %c0_34 = arith.constant 0 : index
    %c0_35 = arith.constant 0 : index
    %70 = vector.load %arg5[%c0_33, %69, %c0_34, %c0_35] : memref<1x4x8x12xf32, #tpu.memory_space<vmem>>, vector<1x1x8x12xf32>
    %71 = vector.shape_cast %70 : vector<1x1x8x12xf32> to vector<8x12xf32>
    %72 = arith.subf %71, %3 : vector<8x12xf32>
    %73 = arith.mulf %68, %68 : vector<8x12xf32>
    %74 = arith.mulf %72, %72 : vector<8x12xf32>
    %75 = arith.addf %73, %74 : vector<8x12xf32>
    %76 = math.sqrt %75 : vector<8x12xf32>
    %77 = arith.mulf %76, %5 : vector<8x12xf32>
    %cst_36 = arith.constant dense<0.000000e+00> : vector<8xf32>
    %78 = vector.multi_reduction <add>, %77, %cst_36 [1] : vector<8x12xf32> to vector<8xf32>
    %79 = vector.shape_cast %78 : vector<8xf32> to vector<8x1xf32>
    %80 = arith.cmpf olt, %79, %62 : vector<8x1xf32>
    %81 = arith.select %80, %79, %62 : vector<8x1xi1>, vector<8x1xf32>
    %82 = vector.broadcast %c3_i32 : i32 to vector<8x1xi32>
    %83 = arith.select %80, %82, %64 : vector<8x1xi1>, vector<8x1xi32>
    %c4_i32 = arith.constant 4 : i32
    %cst_37 = arith.constant 0.000000e+00 : f32
    %84 = vector.broadcast %cst_37 : f32 to vector<8x12xf32>
    %cst_38 = arith.constant 1.000000e+00 : f32
    %85 = vector.broadcast %cst_38 : f32 to vector<8x12xf32>
    %c0_i32_39 = arith.constant 0 : i32
    %86 = vector.broadcast %c0_i32_39 : i32 to vector<8x1xi32>
    %87 = arith.cmpi eq, %83, %86 : vector<8x1xi32>
    %c0_40 = arith.constant 0 : index
    %88 = arith.index_cast %c0_i32_39 : i32 to index
    %c0_41 = arith.constant 0 : index
    %c0_42 = arith.constant 0 : index
    %89 = vector.load %arg4[%c0_40, %88, %c0_41, %c0_42] : memref<1x4x8x12xf32, #tpu.memory_space<vmem>>, vector<1x1x8x12xf32>
    %90 = vector.shape_cast %89 : vector<1x1x8x12xf32> to vector<8x12xf32>
    %91 = vector.shape_cast %87 : vector<8x1xi1> to vector<8x1xi1>
    %92 = vector.broadcast %91 : vector<8x1xi1> to vector<8x12xi1>
    %93 = arith.select %92, %90, %84 : vector<8x12xi1>, vector<8x12xf32>
    %c0_43 = arith.constant 0 : index
    %94 = arith.index_cast %c0_i32_39 : i32 to index
    %c0_44 = arith.constant 0 : index
    %c0_45 = arith.constant 0 : index
    %95 = vector.load %arg5[%c0_43, %94, %c0_44, %c0_45] : memref<1x4x8x12xf32, #tpu.memory_space<vmem>>, vector<1x1x8x12xf32>
    %96 = vector.shape_cast %95 : vector<1x1x8x12xf32> to vector<8x12xf32>
    %97 = vector.shape_cast %87 : vector<8x1xi1> to vector<8x1xi1>
    %98 = vector.broadcast %97 : vector<8x1xi1> to vector<8x12xi1>
    %99 = arith.select %98, %96, %84 : vector<8x12xi1>, vector<8x12xf32>
    %c0_46 = arith.constant 0 : index
    %100 = arith.index_cast %c0_i32_39 : i32 to index
    %c0_47 = arith.constant 0 : index
    %c0_48 = arith.constant 0 : index
    %101 = vector.load %arg6[%c0_46, %100, %c0_47, %c0_48] : memref<1x4x8x12xf32, #tpu.memory_space<vmem>>, vector<1x1x8x12xf32>
    %102 = vector.shape_cast %101 : vector<1x1x8x12xf32> to vector<8x12xf32>
    %103 = vector.shape_cast %87 : vector<8x1xi1> to vector<8x1xi1>
    %104 = vector.broadcast %103 : vector<8x1xi1> to vector<8x12xi1>
    %105 = arith.select %104, %102, %85 : vector<8x12xi1>, vector<8x12xf32>
    %c0_49 = arith.constant 0 : index
    %106 = arith.index_cast %c0_i32_39 : i32 to index
    %c0_50 = arith.constant 0 : index
    %c0_51 = arith.constant 0 : index
    %107 = vector.load %arg7[%c0_49, %106, %c0_50, %c0_51] : memref<1x4x8x12xf32, #tpu.memory_space<vmem>>, vector<1x1x8x12xf32>
    %108 = vector.shape_cast %107 : vector<1x1x8x12xf32> to vector<8x12xf32>
    %109 = vector.shape_cast %87 : vector<8x1xi1> to vector<8x1xi1>
    %110 = vector.broadcast %109 : vector<8x1xi1> to vector<8x12xi1>
    %111 = arith.select %110, %108, %85 : vector<8x12xi1>, vector<8x12xf32>
    %c1_i32_52 = arith.constant 1 : i32
    %112 = vector.broadcast %c1_i32_52 : i32 to vector<8x1xi32>
    %113 = arith.cmpi eq, %83, %112 : vector<8x1xi32>
    %c0_53 = arith.constant 0 : index
    %114 = arith.index_cast %c1_i32_52 : i32 to index
    %c0_54 = arith.constant 0 : index
    %c0_55 = arith.constant 0 : index
    %115 = vector.load %arg4[%c0_53, %114, %c0_54, %c0_55] : memref<1x4x8x12xf32, #tpu.memory_space<vmem>>, vector<1x1x8x12xf32>
    %116 = vector.shape_cast %115 : vector<1x1x8x12xf32> to vector<8x12xf32>
    %117 = vector.shape_cast %113 : vector<8x1xi1> to vector<8x1xi1>
    %118 = vector.broadcast %117 : vector<8x1xi1> to vector<8x12xi1>
    %119 = arith.select %118, %116, %93 : vector<8x12xi1>, vector<8x12xf32>
    %c0_56 = arith.constant 0 : index
    %120 = arith.index_cast %c1_i32_52 : i32 to index
    %c0_57 = arith.constant 0 : index
    %c0_58 = arith.constant 0 : index
    %121 = vector.load %arg5[%c0_56, %120, %c0_57, %c0_58] : memref<1x4x8x12xf32, #tpu.memory_space<vmem>>, vector<1x1x8x12xf32>
    %122 = vector.shape_cast %121 : vector<1x1x8x12xf32> to vector<8x12xf32>
    %123 = vector.shape_cast %113 : vector<8x1xi1> to vector<8x1xi1>
    %124 = vector.broadcast %123 : vector<8x1xi1> to vector<8x12xi1>
    %125 = arith.select %124, %122, %99 : vector<8x12xi1>, vector<8x12xf32>
    %c0_59 = arith.constant 0 : index
    %126 = arith.index_cast %c1_i32_52 : i32 to index
    %c0_60 = arith.constant 0 : index
    %c0_61 = arith.constant 0 : index
    %127 = vector.load %arg6[%c0_59, %126, %c0_60, %c0_61] : memref<1x4x8x12xf32, #tpu.memory_space<vmem>>, vector<1x1x8x12xf32>
    %128 = vector.shape_cast %127 : vector<1x1x8x12xf32> to vector<8x12xf32>
    %129 = vector.shape_cast %113 : vector<8x1xi1> to vector<8x1xi1>
    %130 = vector.broadcast %129 : vector<8x1xi1> to vector<8x12xi1>
    %131 = arith.select %130, %128, %105 : vector<8x12xi1>, vector<8x12xf32>
    %c0_62 = arith.constant 0 : index
    %132 = arith.index_cast %c1_i32_52 : i32 to index
    %c0_63 = arith.constant 0 : index
    %c0_64 = arith.constant 0 : index
    %133 = vector.load %arg7[%c0_62, %132, %c0_63, %c0_64] : memref<1x4x8x12xf32, #tpu.memory_space<vmem>>, vector<1x1x8x12xf32>
    %134 = vector.shape_cast %133 : vector<1x1x8x12xf32> to vector<8x12xf32>
    %135 = vector.shape_cast %113 : vector<8x1xi1> to vector<8x1xi1>
    %136 = vector.broadcast %135 : vector<8x1xi1> to vector<8x12xi1>
    %137 = arith.select %136, %134, %111 : vector<8x12xi1>, vector<8x12xf32>
    %c2_i32_65 = arith.constant 2 : i32
    %138 = vector.broadcast %c2_i32_65 : i32 to vector<8x1xi32>
    %139 = arith.cmpi eq, %83, %138 : vector<8x1xi32>
    %c0_66 = arith.constant 0 : index
    %140 = arith.index_cast %c2_i32_65 : i32 to index
    %c0_67 = arith.constant 0 : index
    %c0_68 = arith.constant 0 : index
    %141 = vector.load %arg4[%c0_66, %140, %c0_67, %c0_68] : memref<1x4x8x12xf32, #tpu.memory_space<vmem>>, vector<1x1x8x12xf32>
    %142 = vector.shape_cast %141 : vector<1x1x8x12xf32> to vector<8x12xf32>
    %143 = vector.shape_cast %139 : vector<8x1xi1> to vector<8x1xi1>
    %144 = vector.broadcast %143 : vector<8x1xi1> to vector<8x12xi1>
    %145 = arith.select %144, %142, %119 : vector<8x12xi1>, vector<8x12xf32>
    %c0_69 = arith.constant 0 : index
    %146 = arith.index_cast %c2_i32_65 : i32 to index
    %c0_70 = arith.constant 0 : index
    %c0_71 = arith.constant 0 : index
    %147 = vector.load %arg5[%c0_69, %146, %c0_70, %c0_71] : memref<1x4x8x12xf32, #tpu.memory_space<vmem>>, vector<1x1x8x12xf32>
    %148 = vector.shape_cast %147 : vector<1x1x8x12xf32> to vector<8x12xf32>
    %149 = vector.shape_cast %139 : vector<8x1xi1> to vector<8x1xi1>
    %150 = vector.broadcast %149 : vector<8x1xi1> to vector<8x12xi1>
    %151 = arith.select %150, %148, %125 : vector<8x12xi1>, vector<8x12xf32>
    %c0_72 = arith.constant 0 : index
    %152 = arith.index_cast %c2_i32_65 : i32 to index
    %c0_73 = arith.constant 0 : index
    %c0_74 = arith.constant 0 : index
    %153 = vector.load %arg6[%c0_72, %152, %c0_73, %c0_74] : memref<1x4x8x12xf32, #tpu.memory_space<vmem>>, vector<1x1x8x12xf32>
    %154 = vector.shape_cast %153 : vector<1x1x8x12xf32> to vector<8x12xf32>
    %155 = vector.shape_cast %139 : vector<8x1xi1> to vector<8x1xi1>
    %156 = vector.broadcast %155 : vector<8x1xi1> to vector<8x12xi1>
    %157 = arith.select %156, %154, %131 : vector<8x12xi1>, vector<8x12xf32>
    %c0_75 = arith.constant 0 : index
    %158 = arith.index_cast %c2_i32_65 : i32 to index
    %c0_76 = arith.constant 0 : index
    %c0_77 = arith.constant 0 : index
    %159 = vector.load %arg7[%c0_75, %158, %c0_76, %c0_77] : memref<1x4x8x12xf32, #tpu.memory_space<vmem>>, vector<1x1x8x12xf32>
    %160 = vector.shape_cast %159 : vector<1x1x8x12xf32> to vector<8x12xf32>
    %161 = vector.shape_cast %139 : vector<8x1xi1> to vector<8x1xi1>
    %162 = vector.broadcast %161 : vector<8x1xi1> to vector<8x12xi1>
    %163 = arith.select %162, %160, %137 : vector<8x12xi1>, vector<8x12xf32>
    %c3_i32_78 = arith.constant 3 : i32
    %164 = vector.broadcast %c3_i32_78 : i32 to vector<8x1xi32>
    %165 = arith.cmpi eq, %83, %164 : vector<8x1xi32>
    %c0_79 = arith.constant 0 : index
    %166 = arith.index_cast %c3_i32_78 : i32 to index
    %c0_80 = arith.constant 0 : index
    %c0_81 = arith.constant 0 : index
    %167 = vector.load %arg4[%c0_79, %166, %c0_80, %c0_81] : memref<1x4x8x12xf32, #tpu.memory_space<vmem>>, vector<1x1x8x12xf32>
    %168 = vector.shape_cast %167 : vector<1x1x8x12xf32> to vector<8x12xf32>
    %169 = vector.shape_cast %165 : vector<8x1xi1> to vector<8x1xi1>
    %170 = vector.broadcast %169 : vector<8x1xi1> to vector<8x12xi1>
    %171 = arith.select %170, %168, %145 : vector<8x12xi1>, vector<8x12xf32>
    %c0_82 = arith.constant 0 : index
    %172 = arith.index_cast %c3_i32_78 : i32 to index
    %c0_83 = arith.constant 0 : index
    %c0_84 = arith.constant 0 : index
    %173 = vector.load %arg5[%c0_82, %172, %c0_83, %c0_84] : memref<1x4x8x12xf32, #tpu.memory_space<vmem>>, vector<1x1x8x12xf32>
    %174 = vector.shape_cast %173 : vector<1x1x8x12xf32> to vector<8x12xf32>
    %175 = vector.shape_cast %165 : vector<8x1xi1> to vector<8x1xi1>
    %176 = vector.broadcast %175 : vector<8x1xi1> to vector<8x12xi1>
    %177 = arith.select %176, %174, %151 : vector<8x12xi1>, vector<8x12xf32>
    %c0_85 = arith.constant 0 : index
    %178 = arith.index_cast %c3_i32_78 : i32 to index
    %c0_86 = arith.constant 0 : index
    %c0_87 = arith.constant 0 : index
    %179 = vector.load %arg6[%c0_85, %178, %c0_86, %c0_87] : memref<1x4x8x12xf32, #tpu.memory_space<vmem>>, vector<1x1x8x12xf32>
    %180 = vector.shape_cast %179 : vector<1x1x8x12xf32> to vector<8x12xf32>
    %181 = vector.shape_cast %165 : vector<8x1xi1> to vector<8x1xi1>
    %182 = vector.broadcast %181 : vector<8x1xi1> to vector<8x12xi1>
    %183 = arith.select %182, %180, %157 : vector<8x12xi1>, vector<8x12xf32>
    %c0_88 = arith.constant 0 : index
    %184 = arith.index_cast %c3_i32_78 : i32 to index
    %c0_89 = arith.constant 0 : index
    %c0_90 = arith.constant 0 : index
    %185 = vector.load %arg7[%c0_88, %184, %c0_89, %c0_90] : memref<1x4x8x12xf32, #tpu.memory_space<vmem>>, vector<1x1x8x12xf32>
    %186 = vector.shape_cast %185 : vector<1x1x8x12xf32> to vector<8x12xf32>
    %187 = vector.shape_cast %165 : vector<8x1xi1> to vector<8x1xi1>
    %188 = vector.broadcast %187 : vector<8x1xi1> to vector<8x12xi1>
    %189 = arith.select %188, %186, %163 : vector<8x12xi1>, vector<8x12xf32>
    %c4_i32_91 = arith.constant 4 : i32
    %cst_92 = arith.constant 4.000000e+00 : f32
    %190 = vector.broadcast %cst_92 : f32 to vector<8x12xf32>
    %191 = arith.mulf %190, %183 : vector<8x12xf32>
    %192 = arith.mulf %191, %189 : vector<8x12xf32>
    %193 = math.log %192 : vector<8x12xf32>
    %194 = arith.subf %1, %171 : vector<8x12xf32>
    %195 = math.absf %194 : vector<8x12xf32>
    %196 = arith.divf %195, %183 : vector<8x12xf32>
    %197 = arith.addf %193, %196 : vector<8x12xf32>
    %198 = arith.subf %3, %177 : vector<8x12xf32>
    %199 = math.absf %198 : vector<8x12xf32>
    %200 = arith.divf %199, %189 : vector<8x12xf32>
    %201 = arith.addf %197, %200 : vector<8x12xf32>
    %202 = arith.mulf %201, %5 : vector<8x12xf32>
    %cst_93 = arith.constant dense<0.000000e+00> : vector<8xf32>
    %203 = vector.multi_reduction <add>, %202, %cst_93 [1] : vector<8x12xf32> to vector<8xf32>
    %204 = vector.shape_cast %203 : vector<8xf32> to vector<8x1xf32>
    %cst_94 = arith.constant 0.000000e+00 : f32
    %205 = vector.broadcast %cst_94 : f32 to vector<8x12xf32>
    %cst_95 = arith.constant 1.000000e+00 : f32
    %206 = vector.broadcast %cst_95 : f32 to vector<8x12xf32>
    %c0_i32_96 = arith.constant 0 : i32
    %207 = vector.broadcast %c0_i32_96 : i32 to vector<8x1xi32>
    %208 = arith.cmpi eq, %83, %207 : vector<8x1xi32>
    %c0_97 = arith.constant 0 : index
    %209 = arith.index_cast %c0_i32_96 : i32 to index
    %c0_98 = arith.constant 0 : index
    %c0_99 = arith.constant 0 : index
    %210 = vector.load %arg8[%c0_97, %209, %c0_98, %c0_99] : memref<1x4x8x12xf32, #tpu.memory_space<vmem>>, vector<1x1x8x12xf32>
    %211 = vector.shape_cast %210 : vector<1x1x8x12xf32> to vector<8x12xf32>
    %212 = vector.shape_cast %208 : vector<8x1xi1> to vector<8x1xi1>
    %213 = vector.broadcast %212 : vector<8x1xi1> to vector<8x12xi1>
    %214 = arith.select %213, %211, %205 : vector<8x12xi1>, vector<8x12xf32>
    %c0_100 = arith.constant 0 : index
    %215 = arith.index_cast %c0_i32_96 : i32 to index
    %c0_101 = arith.constant 0 : index
    %c0_102 = arith.constant 0 : index
    %216 = vector.load %arg9[%c0_100, %215, %c0_101, %c0_102] : memref<1x4x8x12xf32, #tpu.memory_space<vmem>>, vector<1x1x8x12xf32>
    %217 = vector.shape_cast %216 : vector<1x1x8x12xf32> to vector<8x12xf32>
    %218 = vector.shape_cast %208 : vector<8x1xi1> to vector<8x1xi1>
    %219 = vector.broadcast %218 : vector<8x1xi1> to vector<8x12xi1>
    %220 = arith.select %219, %217, %205 : vector<8x12xi1>, vector<8x12xf32>
    %c0_103 = arith.constant 0 : index
    %221 = arith.index_cast %c0_i32_96 : i32 to index
    %c0_104 = arith.constant 0 : index
    %c0_105 = arith.constant 0 : index
    %222 = vector.load %arg10[%c0_103, %221, %c0_104, %c0_105] : memref<1x4x8x12xf32, #tpu.memory_space<vmem>>, vector<1x1x8x12xf32>
    %223 = vector.shape_cast %222 : vector<1x1x8x12xf32> to vector<8x12xf32>
    %224 = vector.shape_cast %208 : vector<8x1xi1> to vector<8x1xi1>
    %225 = vector.broadcast %224 : vector<8x1xi1> to vector<8x12xi1>
    %226 = arith.select %225, %223, %206 : vector<8x12xi1>, vector<8x12xf32>
    %c0_106 = arith.constant 0 : index
    %227 = arith.index_cast %c0_i32_96 : i32 to index
    %c0_107 = arith.constant 0 : index
    %c0_108 = arith.constant 0 : index
    %228 = vector.load %arg11[%c0_106, %227, %c0_107, %c0_108] : memref<1x4x8x12xf32, #tpu.memory_space<vmem>>, vector<1x1x8x12xf32>
    %229 = vector.shape_cast %228 : vector<1x1x8x12xf32> to vector<8x12xf32>
    %230 = vector.shape_cast %208 : vector<8x1xi1> to vector<8x1xi1>
    %231 = vector.broadcast %230 : vector<8x1xi1> to vector<8x12xi1>
    %232 = arith.select %231, %229, %206 : vector<8x12xi1>, vector<8x12xf32>
    %c1_i32_109 = arith.constant 1 : i32
    %233 = vector.broadcast %c1_i32_109 : i32 to vector<8x1xi32>
    %234 = arith.cmpi eq, %83, %233 : vector<8x1xi32>
    %c0_110 = arith.constant 0 : index
    %235 = arith.index_cast %c1_i32_109 : i32 to index
    %c0_111 = arith.constant 0 : index
    %c0_112 = arith.constant 0 : index
    %236 = vector.load %arg8[%c0_110, %235, %c0_111, %c0_112] : memref<1x4x8x12xf32, #tpu.memory_space<vmem>>, vector<1x1x8x12xf32>
    %237 = vector.shape_cast %236 : vector<1x1x8x12xf32> to vector<8x12xf32>
    %238 = vector.shape_cast %234 : vector<8x1xi1> to vector<8x1xi1>
    %239 = vector.broadcast %238 : vector<8x1xi1> to vector<8x12xi1>
    %240 = arith.select %239, %237, %214 : vector<8x12xi1>, vector<8x12xf32>
    %c0_113 = arith.constant 0 : index
    %241 = arith.index_cast %c1_i32_109 : i32 to index
    %c0_114 = arith.constant 0 : index
    %c0_115 = arith.constant 0 : index
    %242 = vector.load %arg9[%c0_113, %241, %c0_114, %c0_115] : memref<1x4x8x12xf32, #tpu.memory_space<vmem>>, vector<1x1x8x12xf32>
    %243 = vector.shape_cast %242 : vector<1x1x8x12xf32> to vector<8x12xf32>
    %244 = vector.shape_cast %234 : vector<8x1xi1> to vector<8x1xi1>
    %245 = vector.broadcast %244 : vector<8x1xi1> to vector<8x12xi1>
    %246 = arith.select %245, %243, %220 : vector<8x12xi1>, vector<8x12xf32>
    %c0_116 = arith.constant 0 : index
    %247 = arith.index_cast %c1_i32_109 : i32 to index
    %c0_117 = arith.constant 0 : index
    %c0_118 = arith.constant 0 : index
    %248 = vector.load %arg10[%c0_116, %247, %c0_117, %c0_118] : memref<1x4x8x12xf32, #tpu.memory_space<vmem>>, vector<1x1x8x12xf32>
    %249 = vector.shape_cast %248 : vector<1x1x8x12xf32> to vector<8x12xf32>
    %250 = vector.shape_cast %234 : vector<8x1xi1> to vector<8x1xi1>
    %251 = vector.broadcast %250 : vector<8x1xi1> to vector<8x12xi1>
    %252 = arith.select %251, %249, %226 : vector<8x12xi1>, vector<8x12xf32>
    %c0_119 = arith.constant 0 : index
    %253 = arith.index_cast %c1_i32_109 : i32 to index
    %c0_120 = arith.constant 0 : index
    %c0_121 = arith.constant 0 : index
    %254 = vector.load %arg11[%c0_119, %253, %c0_120, %c0_121] : memref<1x4x8x12xf32, #tpu.memory_space<vmem>>, vector<1x1x8x12xf32>
    %255 = vector.shape_cast %254 : vector<1x1x8x12xf32> to vector<8x12xf32>
    %256 = vector.shape_cast %234 : vector<8x1xi1> to vector<8x1xi1>
    %257 = vector.broadcast %256 : vector<8x1xi1> to vector<8x12xi1>
    %258 = arith.select %257, %255, %232 : vector<8x12xi1>, vector<8x12xf32>
    %c2_i32_122 = arith.constant 2 : i32
    %259 = vector.broadcast %c2_i32_122 : i32 to vector<8x1xi32>
    %260 = arith.cmpi eq, %83, %259 : vector<8x1xi32>
    %c0_123 = arith.constant 0 : index
    %261 = arith.index_cast %c2_i32_122 : i32 to index
    %c0_124 = arith.constant 0 : index
    %c0_125 = arith.constant 0 : index
    %262 = vector.load %arg8[%c0_123, %261, %c0_124, %c0_125] : memref<1x4x8x12xf32, #tpu.memory_space<vmem>>, vector<1x1x8x12xf32>
    %263 = vector.shape_cast %262 : vector<1x1x8x12xf32> to vector<8x12xf32>
    %264 = vector.shape_cast %260 : vector<8x1xi1> to vector<8x1xi1>
    %265 = vector.broadcast %264 : vector<8x1xi1> to vector<8x12xi1>
    %266 = arith.select %265, %263, %240 : vector<8x12xi1>, vector<8x12xf32>
    %c0_126 = arith.constant 0 : index
    %267 = arith.index_cast %c2_i32_122 : i32 to index
    %c0_127 = arith.constant 0 : index
    %c0_128 = arith.constant 0 : index
    %268 = vector.load %arg9[%c0_126, %267, %c0_127, %c0_128] : memref<1x4x8x12xf32, #tpu.memory_space<vmem>>, vector<1x1x8x12xf32>
    %269 = vector.shape_cast %268 : vector<1x1x8x12xf32> to vector<8x12xf32>
    %270 = vector.shape_cast %260 : vector<8x1xi1> to vector<8x1xi1>
    %271 = vector.broadcast %270 : vector<8x1xi1> to vector<8x12xi1>
    %272 = arith.select %271, %269, %246 : vector<8x12xi1>, vector<8x12xf32>
    %c0_129 = arith.constant 0 : index
    %273 = arith.index_cast %c2_i32_122 : i32 to index
    %c0_130 = arith.constant 0 : index
    %c0_131 = arith.constant 0 : index
    %274 = vector.load %arg10[%c0_129, %273, %c0_130, %c0_131] : memref<1x4x8x12xf32, #tpu.memory_space<vmem>>, vector<1x1x8x12xf32>
    %275 = vector.shape_cast %274 : vector<1x1x8x12xf32> to vector<8x12xf32>
    %276 = vector.shape_cast %260 : vector<8x1xi1> to vector<8x1xi1>
    %277 = vector.broadcast %276 : vector<8x1xi1> to vector<8x12xi1>
    %278 = arith.select %277, %275, %252 : vector<8x12xi1>, vector<8x12xf32>
    %c0_132 = arith.constant 0 : index
    %279 = arith.index_cast %c2_i32_122 : i32 to index
    %c0_133 = arith.constant 0 : index
    %c0_134 = arith.constant 0 : index
    %280 = vector.load %arg11[%c0_132, %279, %c0_133, %c0_134] : memref<1x4x8x12xf32, #tpu.memory_space<vmem>>, vector<1x1x8x12xf32>
    %281 = vector.shape_cast %280 : vector<1x1x8x12xf32> to vector<8x12xf32>
    %282 = vector.shape_cast %260 : vector<8x1xi1> to vector<8x1xi1>
    %283 = vector.broadcast %282 : vector<8x1xi1> to vector<8x12xi1>
    %284 = arith.select %283, %281, %258 : vector<8x12xi1>, vector<8x12xf32>
    %c3_i32_135 = arith.constant 3 : i32
    %285 = vector.broadcast %c3_i32_135 : i32 to vector<8x1xi32>
    %286 = arith.cmpi eq, %83, %285 : vector<8x1xi32>
    %c0_136 = arith.constant 0 : index
    %287 = arith.index_cast %c3_i32_135 : i32 to index
    %c0_137 = arith.constant 0 : index
    %c0_138 = arith.constant 0 : index
    %288 = vector.load %arg8[%c0_136, %287, %c0_137, %c0_138] : memref<1x4x8x12xf32, #tpu.memory_space<vmem>>, vector<1x1x8x12xf32>
    %289 = vector.shape_cast %288 : vector<1x1x8x12xf32> to vector<8x12xf32>
    %290 = vector.shape_cast %286 : vector<8x1xi1> to vector<8x1xi1>
    %291 = vector.broadcast %290 : vector<8x1xi1> to vector<8x12xi1>
    %292 = arith.select %291, %289, %266 : vector<8x12xi1>, vector<8x12xf32>
    %c0_139 = arith.constant 0 : index
    %293 = arith.index_cast %c3_i32_135 : i32 to index
    %c0_140 = arith.constant 0 : index
    %c0_141 = arith.constant 0 : index
    %294 = vector.load %arg9[%c0_139, %293, %c0_140, %c0_141] : memref<1x4x8x12xf32, #tpu.memory_space<vmem>>, vector<1x1x8x12xf32>
    %295 = vector.shape_cast %294 : vector<1x1x8x12xf32> to vector<8x12xf32>
    %296 = vector.shape_cast %286 : vector<8x1xi1> to vector<8x1xi1>
    %297 = vector.broadcast %296 : vector<8x1xi1> to vector<8x12xi1>
    %298 = arith.select %297, %295, %272 : vector<8x12xi1>, vector<8x12xf32>
    %c0_142 = arith.constant 0 : index
    %299 = arith.index_cast %c3_i32_135 : i32 to index
    %c0_143 = arith.constant 0 : index
    %c0_144 = arith.constant 0 : index
    %300 = vector.load %arg10[%c0_142, %299, %c0_143, %c0_144] : memref<1x4x8x12xf32, #tpu.memory_space<vmem>>, vector<1x1x8x12xf32>
    %301 = vector.shape_cast %300 : vector<1x1x8x12xf32> to vector<8x12xf32>
    %302 = vector.shape_cast %286 : vector<8x1xi1> to vector<8x1xi1>
    %303 = vector.broadcast %302 : vector<8x1xi1> to vector<8x12xi1>
    %304 = arith.select %303, %301, %278 : vector<8x12xi1>, vector<8x12xf32>
    %c0_145 = arith.constant 0 : index
    %305 = arith.index_cast %c3_i32_135 : i32 to index
    %c0_146 = arith.constant 0 : index
    %c0_147 = arith.constant 0 : index
    %306 = vector.load %arg11[%c0_145, %305, %c0_146, %c0_147] : memref<1x4x8x12xf32, #tpu.memory_space<vmem>>, vector<1x1x8x12xf32>
    %307 = vector.shape_cast %306 : vector<1x1x8x12xf32> to vector<8x12xf32>
    %308 = vector.shape_cast %286 : vector<8x1xi1> to vector<8x1xi1>
    %309 = vector.broadcast %308 : vector<8x1xi1> to vector<8x12xi1>
    %310 = arith.select %309, %307, %284 : vector<8x12xi1>, vector<8x12xf32>
    %c4_i32_148 = arith.constant 4 : i32
    %cst_149 = arith.constant 4.000000e+00 : f32
    %311 = vector.broadcast %cst_149 : f32 to vector<8x12xf32>
    %312 = arith.mulf %311, %304 : vector<8x12xf32>
    %313 = arith.mulf %312, %310 : vector<8x12xf32>
    %314 = math.log %313 : vector<8x12xf32>
    %315 = arith.subf %1, %292 : vector<8x12xf32>
    %316 = math.absf %315 : vector<8x12xf32>
    %317 = arith.divf %316, %304 : vector<8x12xf32>
    %318 = arith.addf %314, %317 : vector<8x12xf32>
    %319 = arith.subf %3, %298 : vector<8x12xf32>
    %320 = math.absf %319 : vector<8x12xf32>
    %321 = arith.divf %320, %310 : vector<8x12xf32>
    %322 = arith.addf %318, %321 : vector<8x12xf32>
    %323 = arith.mulf %322, %5 : vector<8x12xf32>
    %cst_150 = arith.constant dense<0.000000e+00> : vector<8xf32>
    %324 = vector.multi_reduction <add>, %323, %cst_150 [1] : vector<8x12xf32> to vector<8xf32>
    %325 = vector.shape_cast %324 : vector<8xf32> to vector<8x1xf32>
    %cst_151 = arith.constant dense<0.000000e+00> : vector<8xf32>
    %326 = vector.multi_reduction <add>, %5, %cst_151 [1] : vector<8x12xf32> to vector<8xf32>
    %327 = vector.shape_cast %326 : vector<8xf32> to vector<8x1xf32>
    %cst_152 = arith.constant 1.000000e+00 : f32
    %328 = vector.broadcast %cst_152 : f32 to vector<8x1xf32>
    %329 = arith.maximumf %327, %328 : vector<8x1xf32>
    %cst_153 = arith.constant dense<0xFF800000> : vector<8xf32>
    %330 = vector.multi_reduction <maximumf>, %5, %cst_153 [1] : vector<8x12xf32> to vector<8xf32>
    %331 = vector.shape_cast %330 : vector<8xf32> to vector<8x1xf32>
    %cst_154 = arith.constant 0.000000e+00 : f32
    %332 = vector.broadcast %cst_154 : f32 to vector<8x1xf32>
    %333 = arith.cmpf ogt, %331, %332 : vector<8x1xf32>
    %334 = arith.extui %333 : vector<8x1xi1> to vector<8x1xi32>
    %335 = arith.sitofp %334 : vector<8x1xi32> to vector<8x1xf32>
    %336 = vector.shape_cast %335 : vector<8x1xf32> to vector<1x8x1xf32>
    %cst_155 = arith.constant dense<0.000000e+00> : vector<1xf32>
    %337 = vector.multi_reduction <add>, %336, %cst_155 [1, 2] : vector<1x8x1xf32> to vector<1xf32>
    %338 = vector.shape_cast %337 : vector<1xf32> to vector<1x1x1xf32>
    %339 = vector.extract %338[0, 0, 0] : f32 from vector<1x1x1xf32>
    %cst_156 = arith.constant 1.000000e+00 : f32
    %340 = arith.maximumf %339, %cst_156 : f32
    %341 = arith.divf %204, %329 : vector<8x1xf32>
    %342 = vector.shape_cast %341 : vector<8x1xf32> to vector<1x8x1xf32>
    %cst_157 = arith.constant dense<0.000000e+00> : vector<1xf32>
    %343 = vector.multi_reduction <add>, %342, %cst_157 [1, 2] : vector<1x8x1xf32> to vector<1xf32>
    %344 = vector.shape_cast %343 : vector<1xf32> to vector<1x1x1xf32>
    %345 = vector.extract %344[0, 0, 0] : f32 from vector<1x1x1xf32>
    %346 = arith.divf %345, %340 : f32
    %347 = arith.divf %325, %329 : vector<8x1xf32>
    %348 = vector.shape_cast %347 : vector<8x1xf32> to vector<1x8x1xf32>
    %cst_158 = arith.constant dense<0.000000e+00> : vector<1xf32>
    %349 = vector.multi_reduction <add>, %348, %cst_158 [1, 2] : vector<1x8x1xf32> to vector<1xf32>
    %350 = vector.shape_cast %349 : vector<1xf32> to vector<1x1x1xf32>
    %351 = vector.extract %350[0, 0, 0] : f32 from vector<1x1x1xf32>
    %352 = arith.divf %351, %340 : f32
    %353 = vector.extract_strided_slice %1 {offsets = [0, 11], sizes = [8, 1], strides = [1, 1]} : vector<8x12xf32> to vector<8x1xf32>
    %354 = vector.extract_strided_slice %3 {offsets = [0, 11], sizes = [8, 1], strides = [1, 1]} : vector<8x12xf32> to vector<8x1xf32>
    %355 = vector.extract_strided_slice %5 {offsets = [0, 11], sizes = [8, 1], strides = [1, 1]} : vector<8x12xf32> to vector<8x1xf32>
    %c0_159 = arith.constant 0 : index
    %c0_160 = arith.constant 0 : index
    %c0_161 = arith.constant 0 : index
    %c11 = arith.constant 11 : index
    %356 = vector.load %arg8[%c0_159, %c0_160, %c0_161, %c11] : memref<1x4x8x12xf32, #tpu.memory_space<vmem>>, vector<1x4x8x1xf32>
    %357 = vector.shape_cast %356 : vector<1x4x8x1xf32> to vector<4x8x1xf32>
    %c0_162 = arith.constant 0 : index
    %c0_163 = arith.constant 0 : index
    %c0_164 = arith.constant 0 : index
    %c11_165 = arith.constant 11 : index
    %358 = vector.load %arg9[%c0_162, %c0_163, %c0_164, %c11_165] : memref<1x4x8x12xf32, #tpu.memory_space<vmem>>, vector<1x4x8x1xf32>
    %359 = vector.shape_cast %358 : vector<1x4x8x1xf32> to vector<4x8x1xf32>
    %c0_166 = arith.constant 0 : index
    %c0_167 = arith.constant 0 : index
    %c0_168 = arith.constant 0 : index
    %c11_169 = arith.constant 11 : index
    %360 = vector.load %arg10[%c0_166, %c0_167, %c0_168, %c11_169] : memref<1x4x8x12xf32, #tpu.memory_space<vmem>>, vector<1x4x8x1xf32>
    %361 = vector.shape_cast %360 : vector<1x4x8x1xf32> to vector<4x8x1xf32>
    %c0_170 = arith.constant 0 : index
    %c0_171 = arith.constant 0 : index
    %c0_172 = arith.constant 0 : index
    %c11_173 = arith.constant 11 : index
    %362 = vector.load %arg11[%c0_170, %c0_171, %c0_172, %c11_173] : memref<1x4x8x12xf32, #tpu.memory_space<vmem>>, vector<1x4x8x1xf32>
    %363 = vector.shape_cast %362 : vector<1x4x8x1xf32> to vector<4x8x1xf32>
    %cst_174 = arith.constant 4.000000e+00 : f32
    %364 = vector.broadcast %cst_174 : f32 to vector<4x8x1xf32>
    %365 = arith.mulf %364, %361 : vector<4x8x1xf32>
    %366 = arith.mulf %365, %363 : vector<4x8x1xf32>
    %367 = math.log %366 : vector<4x8x1xf32>
    %368 = vector.shape_cast %353 : vector<8x1xf32> to vector<1x8x1xf32>
    %369 = vector.broadcast %368 : vector<1x8x1xf32> to vector<4x8x1xf32>
    %370 = arith.subf %369, %357 : vector<4x8x1xf32>
    %371 = math.absf %370 : vector<4x8x1xf32>
    %372 = arith.divf %371, %361 : vector<4x8x1xf32>
    %373 = arith.addf %367, %372 : vector<4x8x1xf32>
    %374 = vector.shape_cast %354 : vector<8x1xf32> to vector<1x8x1xf32>
    %375 = vector.broadcast %374 : vector<1x8x1xf32> to vector<4x8x1xf32>
    %376 = arith.subf %375, %359 : vector<4x8x1xf32>
    %377 = math.absf %376 : vector<4x8x1xf32>
    %378 = arith.divf %377, %363 : vector<4x8x1xf32>
    %379 = arith.addf %373, %378 : vector<4x8x1xf32>
    %380 = vector.shape_cast %355 : vector<8x1xf32> to vector<1x8x1xf32>
    %381 = vector.broadcast %380 : vector<1x8x1xf32> to vector<4x8x1xf32>
    %382 = arith.mulf %379, %381 : vector<4x8x1xf32>
    %c0_175 = arith.constant 0 : index
    %c0_176 = arith.constant 0 : index
    %c0_177 = arith.constant 0 : index
    %c0_178 = arith.constant 0 : index
    %383 = vector.load %arg12[%c0_175, %c0_176, %c0_177, %c0_178] : memref<1x4x8x1xf32, #tpu.memory_space<vmem>>, vector<1x4x8x1xf32>
    %384 = vector.shape_cast %383 : vector<1x4x8x1xf32> to vector<4x8x1xf32>
    %cst_179 = arith.constant dense<0xFF800000> : vector<8x1xf32>
    %385 = vector.multi_reduction <maximumf>, %384, %cst_179 [0] : vector<4x8x1xf32> to vector<8x1xf32>
    %386 = vector.shape_cast %385 : vector<8x1xf32> to vector<1x8x1xf32>
    %387 = vector.broadcast %386 : vector<1x8x1xf32> to vector<4x8x1xf32>
    %388 = arith.subf %384, %387 : vector<4x8x1xf32>
    %389 = math.exp %388 : vector<4x8x1xf32>
    %cst_180 = arith.constant dense<0.000000e+00> : vector<8x1xf32>
    %390 = vector.multi_reduction <add>, %389, %cst_180 [0] : vector<4x8x1xf32> to vector<8x1xf32>
    %391 = vector.shape_cast %390 : vector<8x1xf32> to vector<1x8x1xf32>
    %392 = math.log %391 : vector<1x8x1xf32>
    %393 = arith.addf %392, %386 : vector<1x8x1xf32>
    %394 = vector.broadcast %393 : vector<1x8x1xf32> to vector<4x8x1xf32>
    %395 = arith.subf %384, %394 : vector<4x8x1xf32>
    %396 = arith.subf %395, %382 : vector<4x8x1xf32>
    %cst_181 = arith.constant dense<0xFF800000> : vector<8x1xf32>
    %397 = vector.multi_reduction <maximumf>, %396, %cst_181 [0] : vector<4x8x1xf32> to vector<8x1xf32>
    %398 = vector.shape_cast %397 : vector<8x1xf32> to vector<1x8x1xf32>
    %399 = vector.broadcast %398 : vector<1x8x1xf32> to vector<4x8x1xf32>
    %400 = arith.subf %396, %399 : vector<4x8x1xf32>
    %401 = math.exp %400 : vector<4x8x1xf32>
    %cst_182 = arith.constant dense<0.000000e+00> : vector<8x1xf32>
    %402 = vector.multi_reduction <add>, %401, %cst_182 [0] : vector<4x8x1xf32> to vector<8x1xf32>
    %403 = vector.shape_cast %402 : vector<8x1xf32> to vector<1x8x1xf32>
    %404 = math.log %403 : vector<1x8x1xf32>
    %405 = arith.addf %404, %398 : vector<1x8x1xf32>
    %cst_183 = arith.constant 0.000000e+00 : f32
    %406 = vector.broadcast %cst_183 : f32 to vector<1x8x1xf32>
    %407 = arith.subf %406, %405 : vector<1x8x1xf32>
    %408 = vector.shape_cast %407 : vector<1x8x1xf32> to vector<1x1x8x1xf32>
    %cst_184 = arith.constant dense<0.000000e+00> : vector<1xf32>
    %409 = vector.multi_reduction <add>, %408, %cst_184 [1, 2, 3] : vector<1x1x8x1xf32> to vector<1xf32>
    %410 = vector.shape_cast %409 : vector<1xf32> to vector<1x1x1x1xf32>
    %411 = vector.extract %410[0, 0, 0, 0] : f32 from vector<1x1x1x1xf32>
    %412 = vector.shape_cast %355 : vector<8x1xf32> to vector<1x8x1xf32>
    %cst_185 = arith.constant dense<0.000000e+00> : vector<1xf32>
    %413 = vector.multi_reduction <add>, %412, %cst_185 [1, 2] : vector<1x8x1xf32> to vector<1xf32>
    %414 = vector.shape_cast %413 : vector<1xf32> to vector<1x1x1xf32>
    %415 = vector.extract %414[0, 0, 0] : f32 from vector<1x1x1xf32>
    %416 = tpu.iota {dimensions = array<i32: 1>} : vector<8x128xi32>
    %c0_i32_186 = arith.constant 0 : i32
    %417 = vector.broadcast %c0_i32_186 : i32 to vector<8x128xi32>
    %418 = arith.cmpi eq, %416, %417 : vector<8x128xi32>
    %cst_187 = arith.constant 0.000000e+00 : f32
    %419 = vector.broadcast %346 : f32 to vector<8x128xf32>
    %420 = vector.broadcast %cst_187 : f32 to vector<8x128xf32>
    %421 = arith.select %418, %419, %420 : vector<8x128xi1>, vector<8x128xf32>
    %c1_i32_188 = arith.constant 1 : i32
    %422 = vector.broadcast %c1_i32_188 : i32 to vector<8x128xi32>
    %423 = arith.cmpi eq, %416, %422 : vector<8x128xi32>
    %cst_189 = arith.constant 0.000000e+00 : f32
    %424 = vector.broadcast %352 : f32 to vector<8x128xf32>
    %425 = vector.broadcast %cst_189 : f32 to vector<8x128xf32>
    %426 = arith.select %423, %424, %425 : vector<8x128xi1>, vector<8x128xf32>
    %427 = arith.addf %421, %426 : vector<8x128xf32>
    %c2_i32_190 = arith.constant 2 : i32
    %428 = vector.broadcast %c2_i32_190 : i32 to vector<8x128xi32>
    %429 = arith.cmpi eq, %416, %428 : vector<8x128xi32>
    %cst_191 = arith.constant 0.000000e+00 : f32
    %430 = vector.broadcast %411 : f32 to vector<8x128xf32>
    %431 = vector.broadcast %cst_191 : f32 to vector<8x128xf32>
    %432 = arith.select %429, %430, %431 : vector<8x128xi1>, vector<8x128xf32>
    %433 = arith.addf %427, %432 : vector<8x128xf32>
    %c3_i32_192 = arith.constant 3 : i32
    %434 = vector.broadcast %c3_i32_192 : i32 to vector<8x128xi32>
    %435 = arith.cmpi eq, %416, %434 : vector<8x128xi32>
    %cst_193 = arith.constant 0.000000e+00 : f32
    %436 = vector.broadcast %415 : f32 to vector<8x128xf32>
    %437 = vector.broadcast %cst_193 : f32 to vector<8x128xf32>
    %438 = arith.select %435, %436, %437 : vector<8x128xi1>, vector<8x128xf32>
    %439 = arith.addf %433, %438 : vector<8x128xf32>
    %c0_194 = arith.constant 0 : index
    %c0_195 = arith.constant 0 : index
    %c0_196 = arith.constant 0 : index
    %440 = vector.load %arg13[%c0_194, %c0_195, %c0_196] : memref<1x8x128xf32, #tpu.memory_space<vmem>>, vector<1x8x128xf32>
    %441 = vector.shape_cast %440 : vector<1x8x128xf32> to vector<8x128xf32>
    %442 = vector.shape_cast %439 : vector<8x128xf32> to vector<1x8x128xf32>
    tpu.vector_store %arg13[%c0_194, %c0_195, %c0_196], %442 {strides = array<i32>} : memref<1x8x128xf32, #tpu.memory_space<vmem>>, vector<1x8x128xf32>,
    return
  }
  func.func @transform_0(%arg0: i32) -> (i32, i32, i32) {
    %c0_i32 = arith.constant 0 : i32
    %c0_i32_0 = arith.constant 0 : i32
    %c0_i32_1 = arith.constant 0 : i32
    return %arg0, %c0_i32, %c0_i32_0 : i32, i32, i32
  }
  func.func @transform_1(%arg0: i32) -> (i32, i32, i32) {
    %c0_i32 = arith.constant 0 : i32
    %c0_i32_0 = arith.constant 0 : i32
    %c0_i32_1 = arith.constant 0 : i32
    return %arg0, %c0_i32, %c0_i32_0 : i32, i32, i32
  }
  func.func @transform_2(%arg0: i32) -> (i32, i32, i32) {
    %c0_i32 = arith.constant 0 : i32
    %c0_i32_0 = arith.constant 0 : i32
    %c0_i32_1 = arith.constant 0 : i32
    return %arg0, %c0_i32, %c0_i32_0 : i32, i32, i32
  }
  func.func @transform_3(%arg0: i32) -> (i32, i32, i32, i32) {
    %c0_i32 = arith.constant 0 : i32
    %c0_i32_0 = arith.constant 0 : i32
    %c0_i32_1 = arith.constant 0 : i32
    %c0_i32_2 = arith.constant 0 : i32
    return %arg0, %c0_i32, %c0_i32_0, %c0_i32_1 : i32, i32, i32, i32
  }
  func.func @transform_4(%arg0: i32) -> (i32, i32, i32, i32) {
    %c0_i32 = arith.constant 0 : i32
    %c0_i32_0 = arith.constant 0 : i32
    %c0_i32_1 = arith.constant 0 : i32
    %c0_i32_2 = arith.constant 0 : i32
    return %arg0, %c0_i32, %c0_i32_0, %c0_i32_1 : i32, i32, i32, i32
  }
  func.func @transform_5(%arg0: i32) -> (i32, i32, i32, i32) {
    %c0_i32 = arith.constant 0 : i32
    %c0_i32_0 = arith.constant 0 : i32
    %c0_i32_1 = arith.constant 0 : i32
    %c0_i32_2 = arith.constant 0 : i32
    return %arg0, %c0_i32, %c0_i32_0, %c0_i32_1 : i32, i32, i32, i32
  }
  func.func @transform_6(%arg0: i32) -> (i32, i32, i32, i32) {
    %c0_i32 = arith.constant 0 : i32
    %c0_i32_0 = arith.constant 0 : i32
    %c0_i32_1 = arith.constant 0 : i32
    %c0_i32_2 = arith.constant 0 : i32
    return %arg0, %c0_i32, %c0_i32_0, %c0_i32_1 : i32, i32, i32, i32
  }
  func.func @transform_7(%arg0: i32) -> (i32, i32, i32, i32) {
    %c0_i32 = arith.constant 0 : i32
    %c0_i32_0 = arith.constant 0 : i32
    %c0_i32_1 = arith.constant 0 : i32
    %c0_i32_2 = arith.constant 0 : i32
    return %arg0, %c0_i32, %c0_i32_0, %c0_i32_1 : i32, i32, i32, i32
  }
  func.func @transform_8(%arg0: i32) -> (i32, i32, i32, i32) {
    %c0_i32 = arith.constant 0 : i32
    %c0_i32_0 = arith.constant 0 : i32
    %c0_i32_1 = arith.constant 0 : i32
    %c0_i32_2 = arith.constant 0 : i32
    return %arg0, %c0_i32, %c0_i32_0, %c0_i32_1 : i32, i32, i32, i32
  }
  func.func @transform_9(%arg0: i32) -> (i32, i32, i32, i32) {
    %c0_i32 = arith.constant 0 : i32
    %c0_i32_0 = arith.constant 0 : i32
    %c0_i32_1 = arith.constant 0 : i32
    %c0_i32_2 = arith.constant 0 : i32
    return %arg0, %c0_i32, %c0_i32_0, %c0_i32_1 : i32, i32, i32, i32
  }
  func.func @transform_10(%arg0: i32) -> (i32, i32, i32, i32) {
    %c0_i32 = arith.constant 0 : i32
    %c0_i32_0 = arith.constant 0 : i32
    %c0_i32_1 = arith.constant 0 : i32
    %c0_i32_2 = arith.constant 0 : i32
    return %arg0, %c0_i32, %c0_i32_0, %c0_i32_1 : i32, i32, i32, i32
  }
  func.func @transform_11(%arg0: i32) -> (i32, i32, i32, i32) {
    %c0_i32 = arith.constant 0 : i32
    %c0_i32_0 = arith.constant 0 : i32
    %c0_i32_1 = arith.constant 0 : i32
    %c0_i32_2 = arith.constant 0 : i32
    return %arg0, %c0_i32, %c0_i32_0, %c0_i32_1 : i32, i32, i32, i32
  }
  func.func @transform_12(%arg0: i32) -> (i32, i32, i32) {
    %c0_i32 = arith.constant 0 : i32
    %c0_i32_0 = arith.constant 0 : i32
    %c0_i32_1 = arith.constant 0 : i32
    return %arg0, %c0_i32, %c0_i32_0 : i32, i32, i32
  }
}

</mosaic_0001>

<bundles_post_ra>
// kernel: tpu_custom_call.1
= control target key start
LH: loop header
LB: loop body
LE: loop exit
PB: predicated region body
PF: predicated region fallthrough
CT: control target
= control target key end

     0   :  { %s3028_s0 = inlined_call_operand.vmem [shape: f32[2,8,12], index: 0, kind: input, shape index: {}]   ;;  %s3029_s1 = inlined_call_operand.hbm [shape: f32[2,8,12], index: 1, kind: input, shape index: {}]   ;;  %s3030_s2 = inlined_call_operand.hbm [shape: f32[2,8,12], index: 2, kind: input, shape index: {}]   ;;  %s3031_s3 = inlined_call_operand.vmem [shape: f32[2,4,8,12], index: 3, kind: input, shape index: {}]   ;;  %s3032_s4 = inlined_call_operand.hbm [shape: f32[2,4,8,12], index: 4, kind: input, shape index: {}]   ;;  %s3033_s5 = inlined_call_operand.hbm [shape: f32[2,4,8,12], index: 5, kind: input, shape index: {}]   ;;  %s3034_s6 = inlined_call_operand.hbm [shape: f32[2,4,8,12], index: 6, kind: input, shape index: {}]   ;;  %s3035_s7 = inlined_call_operand.hbm [shape: f32[2,4,8,12], index: 7, kind: input, shape index: {}]   ;;  %s3036_s8 = inlined_call_operand.hbm [shape: f32[2,4,8,12], index: 8, kind: input, shape index: {}]   ;;  %s3037_s9 = inlined_call_operand.hbm [shape: f32[2,4,8,12], index: 9, kind: input, shape index: {}]   ;;  %s3038_s10 = inlined_call_operand.hbm [shape: f32[2,4,8,12], index: 10, kind: input, shape index: {}]   ;;  %s3039_s11 = inlined_call_operand.vmem [shape: f32[2,4,8,1], index: 11, kind: input, shape index: {}]   ;;  %s3040_s12 = inlined_call_operand.hbm [shape: f32[2,8,128], index: 12, kind: output, shape index: {}]  }
   0x1   :  { %3056 = sst [smem:[#allocation30_spill]] %s3028_s0 }
   0x2   :  { %3057 = sst [smem:[#allocation31_spill]] %s3030_s2 }
   0x3   :  { %3058 = sst [smem:[#allocation32_spill]] %s3031_s3 }
   0x4   :  { %3059 = sst [smem:[#allocation33_spill]] %s3033_s5 }
   0x5   :  { %3060 = sst [smem:[#allocation34_spill]] %s3035_s7 }
   0x6   :  { %3061 = sst [smem:[#allocation35_spill]] %s3037_s9 }
   0x7   :  { %3062 = sst [smem:[#allocation36_spill]] %s3039_s11 }
   0x8   :  { %3063 = sst [smem:[#allocation37_spill]] %s3040_s12 }
   0x9   :  { %17 = vsyncpa [#allocation3], 0 }
   0xa   :  { %19 = vsyncpa [#allocation3 + $0x1], 0 }
   0xb   :  { %20 = vsyncpa [#allocation6], 0 }
   0xc   :  { %22 = vsyncpa [#allocation6 + $0x1], 0 }
   0xd   :  { %23 = vsyncpa [#allocation9], 0 }
   0xe   :  { %25 = vsyncpa [#allocation9 + $0x1], 0 }
   0xf   :  { %26 = vsyncpa [#allocation12], 0 }
  0x10   :  { %28 = vsyncpa [#allocation12 + $0x1], 0 }
  0x11   :  { %29 = vsyncpa [#allocation15], 0 }
  0x12   :  { %31 = vsyncpa [#allocation15 + $0x1], 0 }
  0x13   :  { %32 = vsyncpa [#allocation4], 0 }
  0x14   :  { %34 = vsyncpa [#allocation4 + $0x1], 0  ;;  %s2240_s21 = smov 0   ;;  %s2242_s22 = smov 0  }
  0x15   :  { %s2244_s23 = smov 0   ;;  %s2246_s24 = smov 0  }
  0x16 LB: > { %3064 = sst [smem:[#allocation24_spill]] %s2145_s21  ;;  %s2261_s25 = sadd.s32 4294967295, %s2157_s24   ;;  %s2157_s24 = sphi %s2246_s24, %s3100_s24   ;;  %s2153_s23 = sphi %s2244_s23, %s3102_s23   ;;  %s2149_s22 = sphi %s2242_s22, %s3104_s22   ;;  %s2145_s21 = sphi %s2240_s21, %s3103_s21  }
  0x17   : > { %3065 = sst [smem:[#allocation25_spill]] %s2153_s23  ;;  %s1551_s26 = sadd.s32 4294967294, %s2157_s24  }
  0x18   : > { %s2265_s27 = sadd.s32 1, %s2157_s24   ;;  %s73_s28 = sadd.s32 1, %s2153_s23 }
  0x19   : > { %3066 = sst [smem:[#allocation26_spill]] %s2265_s27  ;;  %s70_s29 = ssub.s32 %s2157_s24, %s2265_s27 }
  0x1a   : > { %p80_p0 = scmp.ne.s32.totalorder %s2153_s23, %s2149_s22  ;;  %p71_p1 = scmp.eq.s32.totalorder %s70_s29, 0 }
  0x1b   : > { %p81_p2 = scmp.eq.s32.totalorder %s2157_s24, 0  ;;  %p86_p3 = scmp.ne.s32.totalorder %s2149_s22, %s2145_s21 }
  0x1c   : > { %p87_p4 = scmp.eq.s32.totalorder %s2261_s25, 0  ;;  %p370_p7 = scmp.eq.s32.totalorder %s2261_s25, 1 }
  0x1d   : > { %s2277_s30 = scalar_select %p71_p1, %s2153_s23, %s73_s28  }
  0x1e   : > { %p82_p5 = por %p81_p2, %p80_p0  ;;  %p2279_p6 = por %p87_p4, %p86_p3 }
  0x1f   : > { %3067 = sst [smem:[#allocation27_spill]] %s2277_s30  ;;  %p376_p8 = scmp.eq.s32.totalorder %s1551_s26, 1 }
  0x20   : > { %s3068_s13 = scalar_select %p2279_p6, 1, 0 }
  0x21   : > { %p1697_p10 = scmp.lt.s32.totalorder %s2157_s24, 2  ;;  %p2286_p11 = por %p370_p7, %p80_p0 }
  0x22   : > { %p2290_p12 = por %p376_p8, %p86_p3  ;;  %s2295_s16 = sand.u32 1, %s2153_s23  }
  0x23   : > { %s3069_s14 = scalar_select %p2286_p11, 1, 0 }
  0x24   : > { %s3071_s15 = scalar_select %p2290_p12, 1, 0 }
  0x25   : > { %3070 = sst [smem:[#allocation28_spill]] %s3069_s14  ;;  %s3046_s17 = sshll.u32 %s2157_s24, 7 }
  0x26   : > { %3072 = sst [smem:[#allocation29_spill]] %s3071_s15  ;;  %s3047_s18 = sshll.u32 %s2295_s16, 3 }
  0x27   : > { %p2299_p13 = pnand %p1697_p10, %p82_p5  ;;  %s2304_s20 = sand.u32 1, %s2157_s24  }
  0x28   : > { %s3074_s2 = sld [smem:[#allocation31_spill]]  ;;  %s425_s30 = scalar_lea.vmem [#allocation5], %s3047_s18 }
  0x29   : > { %s432_s23 = sshll.u32 %s425_s30, 4  ;;  %s2318_s27 = sshll.u32 %s2295_s16, 5  ;;  %s2315_s23 = int_to_ptr.vmem [resolvable:$true] %s432_s23 }
  0x2a   : > { %p2325_p1 = pneg %p2299_p13 }
  0x2e   : > { %s2311_s29 = scalar_lea.hbm %s3074_s2, %s3046_s17  ;;  %s1810_s30 = scalar_lea.hbm %s3074_s2, 256 }
  0x2f   : > { %s1805_s21 = scalar_lea.hbm %s2311_s29, 128  ;;  %p1811_p4 = scmp.lt.u32.totalorder %s2311_s29, %s3074_s2 }
  0x30   : > { %p1806_p0 = scmp.ne.s32.totalorder %s2311_s29, %s1805_s21  ;;  %p1812_p5 = scmp.lt.u32.totalorder %s1810_s30, %s1805_s21 }
  0x31   : > { %p1814_p8 = scmp.lt.u32.totalorder %s1805_s21, %s2311_s29 }
  0x32   : > { %p1808_p2 = pnand %p2325_p1, %p1806_p0  ;;  %p1813_p7 = por %p1812_p5, %p1811_p4 }
  0x34   : > { %p1809_p3 = pneg %p1808_p2  ;;  %p1815_p10 = por %p1814_p8, %p1813_p7 }
  0x36   : > { %p1816_p9 = pnand %p1815_p10, %p1809_p3 }
  0x38   : > { %1819 = shalt.err (!%p1816_p9)
}
  0x39   : > { %s1820_s15 = scalar_lea.vmem %s2315_s23, 128  ;;  %s2159_s17 = smov [#allocation5]  }
  0x3a   : > { %p1821_p0 = scmp.ne.s32.totalorder %s2315_s23, %s1820_s15  ;;  %s1825_s28 = sshll.u32 %s2159_s17, 4  ;;  %s1826_s28 = int_to_ptr.vmem [resolvable:$false] %s1825_s28 }
  0x3b   : > { %s1827_s12 = scalar_lea.vmem %s1826_s28, 256  ;;  %p1828_p11 = scmp.lt.s32.totalorder %s2315_s23, %s1826_s28 }
  0x3c   : > { %p1823_p2 = pnand %p1821_p0, %p2325_p1  ;;  %p1829_p6 = scmp.lt.s32.totalorder %s1827_s12, %s1820_s15 }
  0x3e   : > { %p1824_p12 = pneg %p1823_p2  ;;  %p1830_p4 = por %p1829_p6, %p1828_p11 }
  0x40   : > { %p1831_p5 = pnand %p1830_p4, %p1824_p12 }
  0x42   : > { %1834 = shalt.err (!%p1831_p5)
}
  0x43   : > { %s3076_s21 = scalar_lea.sflag [#allocation6], %s2304_s20  ;;  %p1579_p9 = scmp.ge.s32.totalorder %s2157_s24, 1 }
  0x44   : > { %1671 = dma.hbm_to_vmem [thread:$0]  (!%p2299_p13), %s2311_s29, 128, %s2315_s23, %s3076_s21  }
  0x45   : > { %p600_p3 = scmp.lt.s32.totalorder %s2157_s24, 3  ;;  %s2353_s18 = sshll.u32 %s2157_s24, 9 }
  0x46   : > { %s3078_s5 = sld [smem:[#allocation33_spill]]  ;;  %s472_s12 = scalar_lea.vmem [#allocation8], %s2318_s27 }
  0x47   : > { %p2355_p6 = pnand %p1579_p9, %p600_p3  ;;  %s479_s23 = sshll.u32 %s472_s12, 4  ;;  %s2366_s23 = int_to_ptr.vmem [resolvable:$true] %s479_s23 }
  0x48   : > { %s3053_s29 = scalar_lea.sflag [#allocation9], %s2304_s20 }
  0x49   : > { %s3077_s15 = scalar_select %p2355_p6, 1, 0 }
  0x4c   : > { %s2363_s28 = scalar_lea.hbm %s3078_s5, %s2353_s18  ;;  %s1840_s30 = scalar_lea.hbm %s3078_s5, 1024 }
  0x4d   : > { %s1835_s21 = scalar_lea.hbm %s2363_s28, 512  ;;  %p1841_p8 = scmp.lt.u32.totalorder %s2363_s28, %s3078_s5 }
  0x4e   : > { %p1836_p11 = scmp.ne.s32.totalorder %s2363_s28, %s1835_s21  ;;  %p1842_p10 = scmp.lt.u32.totalorder %s1840_s30, %s1835_s21 }
  0x4f   : > { %p1844_p2 = scmp.lt.u32.totalorder %s1835_s21, %s2363_s28 }
  0x50   : > { %p1838_p12 = pnand %p1836_p11, %p2325_p1  ;;  %p1843_p0 = por %p1842_p10, %p1841_p8 }
  0x52   : > { %p1839_p7 = pneg %p1838_p12  ;;  %p1845_p4 = por %p1844_p2, %p1843_p0 }
  0x54   : > { %p1846_p5 = pnand %p1845_p4, %p1839_p7 }
  0x56   : > { %1849 = shalt.err (!%p1846_p5)
}
  0x57   : > { %s1850_s12 = scalar_lea.vmem %s2366_s23, 512  ;;  %s2160_s2 = smov [#allocation8]  }
  0x58   : > { %p1851_p9 = scmp.ne.s32.totalorder %s2366_s23, %s1850_s12  ;;  %s1855_s14 = sshll.u32 %s2160_s2, 4  ;;  %s1856_s14 = int_to_ptr.vmem [resolvable:$false] %s1855_s14 }
  0x59   : > { %s1857_s11 = scalar_lea.vmem %s1856_s14, 1024  ;;  %p1858_p12 = scmp.lt.s32.totalorder %s2366_s23, %s1856_s14 }
  0x5a   : > { %p1853_p3 = pnand %p1851_p9, %p2325_p1  ;;  %p1859_p6 = scmp.lt.s32.totalorder %s1857_s11, %s1850_s12 }
  0x5c   : > { %p1854_p11 = pneg %p1853_p3  ;;  %p1860_p8 = por %p1859_p6, %p1858_p12 }
  0x5e   : > { %p1861_p10 = pnand %p1860_p8, %p1854_p11 }
  0x60   : > { %1864 = shalt.err (!%p1861_p10)
}
  0x61   : > { %s2161_s21 = smov 128   ;;  %s2162_s30 = smov 8  }
  0x62   : > { %1677 = dma.hbm_to_vmem [thread:$0]  (!%p2299_p13), %s2363_s28, 512, %s2366_s23, %s3053_s29, %s2161_s21, %s2161_s21, %s2162_s30  }
  0x63   : > { %s3079_s7 = sld [smem:[#allocation34_spill]]  ;;  %s514_s14 = scalar_lea.vmem [#allocation11], %s2318_s27 }
  0x64   : > { %s521_s11 = sshll.u32 %s514_s14, 4  ;;  %s3054_s5 = scalar_lea.sflag [#allocation12], %s2304_s20  ;;  %s2402_s11 = int_to_ptr.vmem [resolvable:$true] %s521_s11 }
  0x69   : > { %s2399_s2 = scalar_lea.hbm %s3079_s7, %s2353_s18  ;;  %s1870_s17 = scalar_lea.hbm %s3079_s7, 1024 }
  0x6a   : > { %s1865_s3 = scalar_lea.hbm %s2399_s2, 512  ;;  %p1871_p2 = scmp.lt.u32.totalorder %s2399_s2, %s3079_s7 }
  0x6b   : > { %p1866_p6 = scmp.ne.s32.totalorder %s2399_s2, %s1865_s3  ;;  %p1872_p4 = scmp.lt.u32.totalorder %s1870_s17, %s1865_s3 }
  0x6c   : > { %p1874_p9 = scmp.lt.u32.totalorder %s1865_s3, %s2399_s2 }
  0x6d   : > { %p1868_p7 = pnand %p1866_p6, %p2325_p1  ;;  %p1873_p5 = por %p1872_p4, %p1871_p2 }
  0x6f   : > { %p1869_p0 = pneg %p1868_p7  ;;  %p1875_p3 = por %p1874_p9, %p1873_p5 }
  0x71   : > { %p1876_p11 = pnand %p1875_p3, %p1869_p0 }
  0x73   : > { %1879 = shalt.err (!%p1876_p11)
}
  0x74   : > { %s1880_s14 = scalar_lea.vmem %s2402_s11, 512  ;;  %s2163_s28 = smov [#allocation11]  }
  0x75   : > { %p1881_p12 = scmp.ne.s32.totalorder %s2402_s11, %s1880_s14  ;;  %s1885_s23 = sshll.u32 %s2163_s28, 4  ;;  %s1886_s23 = int_to_ptr.vmem [resolvable:$false] %s1885_s23 }
  0x76   : > { %s1887_s29 = scalar_lea.vmem %s1886_s23, 1024  ;;  %p1888_p6 = scmp.lt.s32.totalorder %s2402_s11, %s1886_s23 }
  0x77   : > { %p1883_p8 = pnand %p1881_p12, %p2325_p1  ;;  %p1889_p7 = scmp.lt.s32.totalorder %s1887_s29, %s1880_s14 }
  0x79   : > { %p1884_p10 = pneg %p1883_p8  ;;  %p1890_p2 = por %p1889_p7, %p1888_p6 }
  0x7b   : > { %p1891_p4 = pnand %p1890_p2, %p1884_p10 }
  0x7d   : > { %1894 = shalt.err (!%p1891_p4)
}
  0x7e   : > { %1683 = dma.hbm_to_vmem [thread:$0]  (!%p2299_p13), %s2399_s2, 512, %s2402_s11, %s3054_s5, %s2161_s21, %s2161_s21, %s2162_s30  }
  0x7f   : > { %s3080_s9 = sld [smem:[#allocation35_spill]]  ;;  %s556_s14 = scalar_lea.vmem [#allocation14], %s2318_s27 }
  0x80   : > { %s563_s28 = sshll.u32 %s556_s14, 4  ;;  %s3055_s23 = scalar_lea.sflag [#allocation15], %s2304_s20  ;;  %s2438_s28 = int_to_ptr.vmem [resolvable:$true] %s563_s28 }
  0x85   : > { %s2435_s12 = scalar_lea.hbm %s3080_s9, %s2353_s18  ;;  %s1900_s3 = scalar_lea.hbm %s3080_s9, 1024 }
  0x86   : > { %s1895_s29 = scalar_lea.hbm %s2435_s12, 512  ;;  %p1901_p3 = scmp.lt.u32.totalorder %s2435_s12, %s3080_s9 }
  0x87   : > { %p1896_p0 = scmp.ne.s32.totalorder %s2435_s12, %s1895_s29  ;;  %p1902_p11 = scmp.lt.u32.totalorder %s1900_s3, %s1895_s29 }
  0x88   : > { %p1904_p8 = scmp.lt.u32.totalorder %s1895_s29, %s2435_s12 }
  0x89   : > { %p1898_p5 = pnand %p1896_p0, %p2325_p1  ;;  %p1903_p12 = por %p1902_p11, %p1901_p3 }
  0x8b   : > { %p1899_p9 = pneg %p1898_p5  ;;  %p1905_p10 = por %p1904_p8, %p1903_p12 }
  0x8d   : > { %p1906_p6 = pnand %p1905_p10, %p1899_p9 }
  0x8f   : > { %1909 = shalt.err (!%p1906_p6)
}
  0x90   : > { %s1910_s14 = scalar_lea.vmem %s2438_s28, 512  ;;  %s2164_s2 = smov [#allocation14]  }
  0x91   : > { %p1911_p7 = scmp.ne.s32.totalorder %s2438_s28, %s1910_s14  ;;  %s1915_s11 = sshll.u32 %s2164_s2, 4  ;;  %s1916_s11 = int_to_ptr.vmem [resolvable:$false] %s1915_s11 }
  0x92   : > { %s1917_s5 = scalar_lea.vmem %s1916_s11, 1024  ;;  %p1918_p0 = scmp.lt.s32.totalorder %s2438_s28, %s1916_s11 }
  0x93   : > { %p1913_p2 = pnand %p1911_p7, %p2325_p1  ;;  %p1919_p5 = scmp.lt.s32.totalorder %s1917_s5, %s1910_s14 }
  0x95   : > { %p1914_p4 = pneg %p1913_p2  ;;  %p1920_p3 = por %p1919_p5, %p1918_p0 }
  0x97   : > { %p1921_p11 = pnand %p1920_p3, %p1914_p4 }
  0x99   : > { %1924 = shalt.err (!%p1921_p11)
}
  0x9a   : > { %1689 = dma.hbm_to_vmem [thread:$0]  (!%p2299_p13), %s2435_s12, 512, %s2438_s28, %s3055_s23, %s2161_s21, %s2161_s21, %s2162_s30  }
  0x9b   : > { %s3081_s29 = sshll.u32 %s2157_s24, 7  ;;  %s3082_s2 = sshll.u32 %s2295_s16, 3 }
  0x9c   : > { %s2472_s14 = scalar_lea.hbm %s3029_s1, %s3081_s29  ;;  %s407_s11 = scalar_lea.vmem [#allocation2], %s3082_s2 }
  0x9d   : > { %s414_s5 = sshll.u32 %s407_s11, 4  ;;  %s2482_s0 = scalar_lea.hbm %s3032_s4, %s2353_s18  ;;  %s2476_s5 = int_to_ptr.vmem [resolvable:$true] %s414_s5 }
  0x9e   : > { %s404_s12 = scalar_lea.sflag [#allocation3], %s2295_s16  ;;  %s1925_s28 = scalar_lea.hbm %s2472_s14, 128 }
  0x9f   : > { %p1926_p9 = scmp.ne.s32.totalorder %s2472_s14, %s1925_s28  ;;  %s1930_s17 = scalar_lea.hbm %s3029_s1, 256 }
  0xa0   : > { %p1931_p10 = scmp.lt.u32.totalorder %s2472_s14, %s3029_s1  ;;  %p1932_p6 = scmp.lt.u32.totalorder %s1930_s17, %s1925_s28 }
  0xa1   : > { %p1928_p12 = pnand %p1926_p9, %p2325_p1  ;;  %p1934_p2 = scmp.lt.u32.totalorder %s1925_s28, %s2472_s14 }
  0xa2   : > { %p1933_p7 = por %p1932_p6, %p1931_p10 }
  0xa3   : > { %p1929_p8 = pneg %p1928_p12 }
  0xa4   : > { %p1935_p4 = por %p1934_p2, %p1933_p7 }
  0xa6   : > { %p1936_p0 = pnand %p1935_p4, %p1929_p8 }
  0xa8   : > { %1939 = shalt.err (!%p1936_p0)
}
  0xa9   : > { %s1940_s7 = scalar_lea.vmem %s2476_s5, 128  ;;  %s2165_s9 = smov [#allocation2]  }
  0xaa   : > { %p1941_p5 = scmp.ne.s32.totalorder %s2476_s5, %s1940_s7  ;;  %s1945_s16 = sshll.u32 %s2165_s9, 4  ;;  %s1946_s16 = int_to_ptr.vmem [resolvable:$false] %s1945_s16 }
  0xab   : > { %s1947_s23 = scalar_lea.vmem %s1946_s16, 256  ;;  %p1948_p9 = scmp.lt.s32.totalorder %s2476_s5, %s1946_s16 }
  0xac   : > { %p1943_p3 = pnand %p1941_p5, %p2325_p1  ;;  %p1949_p12 = scmp.lt.s32.totalorder %s1947_s23, %s1940_s7 }
  0xae   : > { %p1944_p11 = pneg %p1943_p3  ;;  %p1950_p10 = por %p1949_p12, %p1948_p9 }
  0xb0   : > { %p1951_p6 = pnand %p1950_p10, %p1944_p11 }
  0xb2   : > { %1954 = shalt.err (!%p1951_p6)
}
  0xb3   : > { %1668 = dma.hbm_to_vmem [thread:$0]  (!%p2299_p13), %s2472_s14, 128, %s2476_s5, %s404_s12  }
  0xb4   : > { %s451_s11 = scalar_lea.vmem [#allocation7], %s2318_s27  ;;  %s2513_s17 = scalar_lea.hbm %s3034_s6, %s2353_s18 }
  0xb5   : > { %s458_s28 = sshll.u32 %s451_s11, 4  ;;  %s1955_s2 = scalar_lea.hbm %s2482_s0, 512  ;;  %s2507_s28 = int_to_ptr.vmem [resolvable:$true] %s458_s28 }
  0xb6   : > { %p1956_p8 = scmp.ne.s32.totalorder %s2482_s0, %s1955_s2  ;;  %s1960_s16 = scalar_lea.hbm %s3032_s4, 1024 }
  0xb7   : > { %p1961_p4 = scmp.lt.u32.totalorder %s2482_s0, %s3032_s4  ;;  %p1962_p0 = scmp.lt.u32.totalorder %s1960_s16, %s1955_s2 }
  0xb8   : > { %p1958_p7 = pnand %p1956_p8, %p2325_p1  ;;  %p1964_p3 = scmp.lt.u32.totalorder %s1955_s2, %s2482_s0 }
  0xb9   : > { %p1963_p5 = por %p1962_p0, %p1961_p4 }
  0xba   : > { %p1959_p2 = pneg %p1958_p7 }
  0xbb   : > { %p1965_p11 = por %p1964_p3, %p1963_p5 }
  0xbd   : > { %p1966_p9 = pnand %p1965_p11, %p1959_p2 }
  0xbf   : > { %1969 = shalt.err (!%p1966_p9)
}
  0xc0   : > { %s1970_s5 = scalar_lea.vmem %s2507_s28, 512  ;;  %s2166_s12 = smov [#allocation7]  }
  0xc1   : > { %p1971_p12 = scmp.ne.s32.totalorder %s2507_s28, %s1970_s5  ;;  %s1975_s11 = sshll.u32 %s2166_s12, 4  ;;  %s1976_s11 = int_to_ptr.vmem [resolvable:$false] %s1975_s11 }
  0xc2   : > { %s1977_s29 = scalar_lea.vmem %s1976_s11, 1024  ;;  %p1978_p8 = scmp.lt.s32.totalorder %s2507_s28, %s1976_s11 }
  0xc3   : > { %p1973_p10 = pnand %p1971_p12, %p2325_p1  ;;  %p1979_p7 = scmp.lt.s32.totalorder %s1977_s29, %s1970_s5 }
  0xc5   : > { %p1974_p6 = pneg %p1973_p10  ;;  %p1980_p4 = por %p1979_p7, %p1978_p8 }
  0xc7   : > { %p1981_p0 = pnand %p1980_p4, %p1974_p6 }
  0xc9   : > { %1984 = shalt.err (!%p1981_p0)
}
  0xca   : > { %s3083_s3 = scalar_lea.sflag [#allocation6], %s2304_s20  ;;  %s493_s2 = scalar_lea.vmem [#allocation10], %s2318_s27 }
  0xcb   : > { %1674 = dma.hbm_to_vmem [thread:$0]  (!%p2299_p13), %s2482_s0, 512, %s2507_s28, %s3083_s3, %s2161_s21, %s2161_s21, %s2162_s30  }
  0xcc   : > { %s500_s7 = sshll.u32 %s493_s2, 4  ;;  %s2548_s23 = scalar_lea.hbm %s3036_s8, %s2353_s18  ;;  %s2542_s7 = int_to_ptr.vmem [resolvable:$true] %s500_s7 }
  0xcd   : > { %s1985_s14 = scalar_lea.hbm %s2513_s17, 512  ;;  %s1990_s11 = scalar_lea.hbm %s3034_s6, 1024 }
  0xce   : > { %p1986_p2 = scmp.ne.s32.totalorder %s2513_s17, %s1985_s14  ;;  %p1991_p11 = scmp.lt.u32.totalorder %s2513_s17, %s3034_s6 }
  0xcf   : > { %p1992_p9 = scmp.lt.u32.totalorder %s1990_s11, %s1985_s14  ;;  %p1994_p10 = scmp.lt.u32.totalorder %s1985_s14, %s2513_s17 }
  0xd0   : > { %p1988_p5 = pnand %p1986_p2, %p2325_p1 }
  0xd1   : > { %p1993_p12 = por %p1992_p9, %p1991_p11 }
  0xd2   : > { %p1989_p3 = pneg %p1988_p5 }
  0xd3   : > { %p1995_p6 = por %p1994_p10, %p1993_p12 }
  0xd5   : > { %p1996_p8 = pnand %p1995_p6, %p1989_p3 }
  0xd7   : > { %1999 = shalt.err (!%p1996_p8)
}
  0xd8   : > { %s2000_s28 = scalar_lea.vmem %s2542_s7, 512  ;;  %s2167_s3 = smov [#allocation10]  }
  0xd9   : > { %p2001_p7 = scmp.ne.s32.totalorder %s2542_s7, %s2000_s28  ;;  %s2005_s2 = sshll.u32 %s2167_s3, 4  ;;  %s2006_s2 = int_to_ptr.vmem [resolvable:$false] %s2005_s2 }
  0xda   : > { %s2007_s9 = scalar_lea.vmem %s2006_s2, 1024  ;;  %p2008_p2 = scmp.lt.s32.totalorder %s2542_s7, %s2006_s2 }
  0xdb   : > { %p2003_p4 = pnand %p2001_p7, %p2325_p1  ;;  %p2009_p5 = scmp.lt.s32.totalorder %s2007_s9, %s2000_s28 }
  0xdd   : > { %p2004_p0 = pneg %p2003_p4  ;;  %p2010_p11 = por %p2009_p5, %p2008_p2 }
  0xdf   : > { %p2011_p9 = pnand %p2010_p11, %p2004_p0 }
  0xe1   : > { %2014 = shalt.err (!%p2011_p9)
}
  0xe2   : > { %s3084_s16 = scalar_lea.sflag [#allocation9], %s2304_s20  ;;  %s535_s14 = scalar_lea.vmem [#allocation13], %s2318_s27 }
  0xe3   : > { %1680 = dma.hbm_to_vmem [thread:$0]  (!%p2299_p13), %s2513_s17, 512, %s2542_s7, %s3084_s16, %s2161_s21, %s2161_s21, %s2162_s30  }
  0xe4   : > { %s542_s5 = sshll.u32 %s535_s14, 4  ;;  %s2583_s29 = scalar_lea.hbm %s3038_s10, %s2353_s18  ;;  %s2577_s5 = int_to_ptr.vmem [resolvable:$true] %s542_s5 }
  0xe5   : > { %s2015_s0 = scalar_lea.hbm %s2548_s23, 512  ;;  %s2020_s2 = scalar_lea.hbm %s3036_s8, 1024 }
  0xe6   : > { %p2016_p3 = scmp.ne.s32.totalorder %s2548_s23, %s2015_s0  ;;  %p2021_p6 = scmp.lt.u32.totalorder %s2548_s23, %s3036_s8 }
  0xe7   : > { %p2022_p8 = scmp.lt.u32.totalorder %s2020_s2, %s2015_s0  ;;  %p2024_p4 = scmp.lt.u32.totalorder %s2015_s0, %s2548_s23 }
  0xe8   : > { %p2018_p12 = pnand %p2016_p3, %p2325_p1 }
  0xe9   : > { %p2023_p7 = por %p2022_p8, %p2021_p6 }
  0xea   : > { %p2019_p10 = pneg %p2018_p12 }
  0xeb   : > { %p2025_p0 = por %p2024_p4, %p2023_p7 }
  0xed   : > { %p2026_p2 = pnand %p2025_p0, %p2019_p10 }
  0xef   : > { %2029 = shalt.err (!%p2026_p2)
}
  0xf0   : > { %s2030_s18 = scalar_lea.vmem %s2577_s5, 512  ;;  %s2168_s7 = smov [#allocation13]  }
  0xf1   : > { %p2031_p5 = scmp.ne.s32.totalorder %s2577_s5, %s2030_s18  ;;  %s2035_s16 = sshll.u32 %s2168_s7, 4  ;;  %s2036_s16 = int_to_ptr.vmem [resolvable:$false] %s2035_s16 }
  0xf2   : > { %s2037_s14 = scalar_lea.vmem %s2036_s16, 1024  ;;  %p2038_p3 = scmp.lt.s32.totalorder %s2577_s5, %s2036_s16 }
  0xf3   : > { %p2033_p11 = pnand %p2031_p5, %p2325_p1  ;;  %p2039_p12 = scmp.lt.s32.totalorder %s2037_s14, %s2030_s18 }
  0xf5   : > { %p2034_p9 = pneg %p2033_p11  ;;  %p2040_p6 = por %p2039_p12, %p2038_p3 }
  0xf7   : > { %p2041_p8 = pnand %p2040_p6, %p2034_p9 }
  0xf9   : > { %2044 = shalt.err (!%p2041_p8)
}
  0xfa   : > { %s3085_s12 = scalar_lea.sflag [#allocation12], %s2304_s20  ;;  %s577_s11 = scalar_lea.vmem [#allocation16], %s2318_s27 }
  0xfb   : > { %1686 = dma.hbm_to_vmem [thread:$0]  (!%p2299_p13), %s2548_s23, 512, %s2577_s5, %s3085_s12, %s2161_s21, %s2161_s21, %s2162_s30  }
  0xfc   : > { %s584_s0 = sshll.u32 %s577_s11, 4  ;;  %s2045_s28 = scalar_lea.hbm %s2583_s29, 512  ;;  %s2612_s0 = int_to_ptr.vmem [resolvable:$true] %s584_s0 }
  0xfd   : > { %p2046_p10 = scmp.ne.s32.totalorder %s2583_s29, %s2045_s28  ;;  %s2050_s9 = scalar_lea.hbm %s3038_s10, 1024 }
  0xfe   : > { %p2051_p0 = scmp.lt.u32.totalorder %s2583_s29, %s3038_s10  ;;  %p2052_p2 = scmp.lt.u32.totalorder %s2050_s9, %s2045_s28 }
  0xff   : > { %p2048_p7 = pnand %p2046_p10, %p2325_p1  ;;  %p2054_p11 = scmp.lt.u32.totalorder %s2045_s28, %s2583_s29 }
 0x100   : > { %p2053_p5 = por %p2052_p2, %p2051_p0 }
 0x101   : > { %p2049_p4 = pneg %p2048_p7 }
 0x102   : > { %p2055_p9 = por %p2054_p11, %p2053_p5 }
 0x104   : > { %p2056_p3 = pnand %p2055_p9, %p2049_p4 }
 0x106   : > { %2059 = shalt.err (!%p2056_p3)
}
 0x107   : > { %s2060_s27 = scalar_lea.vmem %s2612_s0, 512  ;;  %s2169_s23 = smov [#allocation16]  }
 0x108   : > { %p2061_p12 = scmp.ne.s32.totalorder %s2612_s0, %s2060_s27  ;;  %s2065_s5 = sshll.u32 %s2169_s23, 4  ;;  %s2066_s5 = int_to_ptr.vmem [resolvable:$false] %s2065_s5 }
 0x109   : > { %s2067_s7 = scalar_lea.vmem %s2066_s5, 1024  ;;  %p2068_p10 = scmp.lt.s32.totalorder %s2612_s0, %s2066_s5 }
 0x10a   : > { %p2063_p6 = pnand %p2061_p12, %p2325_p1  ;;  %p2069_p7 = scmp.lt.s32.totalorder %s2067_s7, %s2060_s27 }
 0x10c   : > { %p2064_p8 = pneg %p2063_p6  ;;  %p2070_p0 = por %p2069_p7, %p2068_p10 }
 0x10e   : > { %p2071_p2 = pnand %p2070_p0, %p2064_p8 }
 0x110   : > { %2074 = shalt.err (!%p2071_p2)
}
 0x111   : > { %s3086_s16 = scalar_lea.sflag [#allocation15], %s2304_s20  ;;  %p3087_p1 = scmp.ne.s32.totalorder %s3077_s15, 0 }
 0x112   : > { %1692 = dma.hbm_to_vmem [thread:$0]  (!%p2299_p13), %s2583_s29, 512, %s2612_s0, %s3086_s16, %s2161_s21, %s2161_s21, %s2162_s30  }
 0x113   : > { %604 = sbr.rel (%p3087_p1) target bundleno = 888 (0x378), region = 68  ;;  %s2643_s26 = sand.u32 (!%p3087_p1), 1, %s2149_s22  }
 0x114   : > { %s2646_s14 = sshll.u32 (!%p3087_p1), %s2643_s26, 3  ;;  %s607_s19 = scalar_lea.sflag (!%p3087_p1), [#allocation3], %s2643_s26 }
 0x115   : > { %s610_s12 = scalar_lea.vmem (!%p3087_p1), [#allocation2], %s2646_s14  ;;  %p3088_p4 = scmp.ne.s32.totalorder (!%p3087_p1), %s3068_s13, 0 }
 0x11a   : > { %2120 = dma.done.wait (%p3088_p4), %s607_s19, 128  }
 0x11b   : > { %2122 = vsyncadd (%p3088_p4), %s607_s19, 4294967168  ;;  %s615_s20 = sand.u32 1, %s2261_s25   ;;  %s619_s21 = scalar_lea.vmem [#allocation5], %s2646_s14 }
 0x11c   : > { %s616_s15 = scalar_lea.sflag [#allocation6], %s615_s20 }
 0x11d   : > { %2124 = dma.done.wait (%p3088_p4), %s616_s15, 640  }
 0x11e   : > { %2126 = vsyncadd (%p3088_p4), %s616_s15, 4294966656  ;;  %s2661_s30 = sshll.u32 %s2643_s26, 5  ;;  %s634_s11 = scalar_lea.sflag [#allocation9], %s615_s20 }
 0x11f   : > { %s2664_s29 = scalar_lea.vmem [#allocation7], %s2661_s30  ;;  %s2667_s0 = scalar_lea.vmem [#allocation8], %s2661_s30 }
 0x120   : > { %2128 = dma.done.wait (%p3088_p4), %s634_s11, 1024  }
 0x121   : > { %2130 = vsyncadd (%p3088_p4), %s634_s11, 4294966272  ;;  %s2674_s28 = scalar_lea.vmem [#allocation10], %s2661_s30  ;;  %s652_s3 = scalar_lea.sflag [#allocation12], %s615_s20 }
 0x122   : > { %s2677_s2 = scalar_lea.vmem [#allocation11], %s2661_s30 }
 0x123   : > { %2132 = dma.done.wait (%p3088_p4), %s652_s3, 1024  }
 0x124   : > { %2134 = vsyncadd (%p3088_p4), %s652_s3, 4294966272  ;;  %s2684_s9 = scalar_lea.vmem [#allocation13], %s2661_s30  ;;  %s670_s17 = scalar_lea.sflag [#allocation15], %s615_s20 }
 0x125   : > { %s2687_s18 = scalar_lea.vmem [#allocation14], %s2661_s30 }
 0x126   : > { %2136 = dma.done.wait (%p3088_p4), %s670_s17, 1024  }
 0x127   : > { %2138 = vsyncadd (%p3088_p4), %s670_s17, 4294966272  ;;  %p777_p13 = scmp.lt.s32.totalorder %s2261_s25, 1  ;;  %s3089_s19 = sld [smem:[#allocation30_spill]]  ;;  %v2711_v1 = vld [vmem:[%s610_s12] sm:$0xff]  ;;  %v2727_v8 = vld [vmem:[%s2664_s29 + $0x10] sm:$0xff]  ;;  %vm809_vm0 = vcmask 97280  }
 0x128   : > { %s3090_s11 = sld [smem:[#allocation32_spill]]  ;;  %v2716_v3 = vld [vmem:[%s2664_s29] sm:$0xff]  ;;  %v2732_v10 = vld [vmem:[%s2664_s29 + $0x8] sm:$0xff]  ;;  %v843_v11 = vsub.f32 %v2727_v8, %v2711_v1  ;;  %v2743_v15 = vld [vmem:[%s2664_s29 + $0x18] sm:$0xff]  ;;  %s2759_s12 = scalar_lea.vmem [#allocation16], %s2661_s30 }
 0x129   : > { %s2695_s27 = scalar_select %p777_p13, %s2261_s25, 1  ;;  %v797_v6 = vsub.f32 %v2716_v3, %v2711_v1  ;;  %v820_v13 = vsub.f32 %v2732_v10, %v2711_v1  ;;  %v866_v23 = vsub.f32 %v2743_v15, %v2711_v1  ;;  %v2752_v29 = vld [vmem:[%s2687_s18] sm:$0xff]  ;;  %v2765_v33 = vld [vmem:[%s2687_s18 + $0x10] sm:$0xff]  ;;  %v2774_v37 = vld [vmem:[%s2687_s18 + $0x18] sm:$0xff] }
 0x12a   : > { %v845_v20 = vmul.f32 %v843_v11, %v843_v11  ;;  %v1070_v30 = vmul.f32 4.0, %v2752_v29  ;;  %v2762_v32 = vld [vmem:[%s2759_s12] sm:$0xff]  ;;  %v1072_v36 = vmul.f32 4.0, %v2765_v33  ;;  %v2779_v39 = vld [vmem:[%s2759_s12 + $0x10] sm:$0xff]  ;;  %v2782_v40 = vld [vmem:[%s2687_s18 + $0x8] sm:$0xff]  ;;  %v1073_v43 = vmul.f32 4.0, %v2774_v37 }
 0x12b   : > { %s1590_s23 = sshll.u32 %s2695_s27, 3  ;;  %s1631_s5 = sshll.u32 %s2695_s27, 5  ;;  %v799_v17 = vmul.f32 %v797_v6, %v797_v6  ;;  %v822_v22 = vmul.f32 %v820_v13, %v820_v13  ;;  %v868_v28 = vmul.f32 %v866_v23, %v866_v23  ;;  %v2768_v34 = vld [vmem:[%s2677_s2] sm:$0xff]  ;;  %v2789_v46 = vld [vmem:[%s2759_s12 + $0x18] sm:$0xff]  ;;  %v1071_v47 = vmul.f32 4.0, %v2782_v40  ;;  %v2796_v51 = vld [vmem:[%s2759_s12 + $0x8] sm:$0xff] }
 0x12c   : > { %v1074_v35 = vmul.f32 %v1070_v30, %v2762_v32  ;;  %v1076_v45 = vmul.f32 %v1072_v36, %v2779_v39  ;;  %v2800_v53 = vld [vmem:[%s619_s21] sm:$0xff]  ;;  %v1077_v58 = vmul.f32 %v1073_v43, %v2789_v46  ;;  %s2170_s21 = smov 117   ;;  %s776_s15 = scalar_lea.vmem [#allocation17], %s2646_s14 }
 0x12d   : > { %s780_s20 = scalar_lea.vmem %s3089_s19, %s1590_s23  ;;  %v1075_v61 = vmul.f32 %v1071_v47, %v2796_v51  ;;  %v1009_v36 = vsel %vm809_vm0, %v2800_v53, -inf  ;;  %s3092_s19 = sld [smem:[#allocation28_spill]] }
 0x12e   : > { %s785_s3 = scalar_lea.vmem %s3090_s11, %s1631_s5  ;;  %v2707_v0 = vld [vmem:[%s780_s20] sm:$0xff]  ;;  %s1621_s20 = sshll.u32 %s2261_s25, 7 }
 0x12f   : > { %v2713_v2 = vld [vmem:[%s785_s3] sm:$0xff]  ;;  %v2718_v4 = vld [vmem:[%s785_s3 + $0x10] sm:$0xff]  ;;  %v2729_v9 = vld [vmem:[%s785_s3 + $0x8] sm:$0xff]  ;;  %v1086_v38 = vsub.f32 %v2707_v0, %v2768_v34  ;;  %s1273_s11 = sshll.u32 %s776_s15, 4  ;;  %s2174_s14 = smov [#allocation17]   ;;  %s2986_s11 = int_to_ptr.vmem [resolvable:$true] %s1273_s11 }
 0x130   : > { %v795_v5 = vsub.f32 %v2713_v2, %v2707_v0  ;;  %v840_v7 = vsub.f32 %v2718_v4, %v2707_v0  ;;  %v817_v12 = vsub.f32 %v2729_v9, %v2707_v0  ;;  %v2740_v14 = vld [vmem:[%s785_s3 + $0x18] sm:$0xff]  ;;  %s2075_s25 = scalar_lea.vmem %s2986_s11, 128 }
 0x131   : > { %v863_v19 = vsub.f32 %v2740_v14, %v2707_v0  ;;  %p2076_p5 = scmp.ne.s32.totalorder %s2986_s11, %s2075_s25 }
 0x132   : > { %v798_v16 = vmul.f32 %v795_v5, %v795_v5  ;;  %v844_v18 = vmul.f32 %v840_v7, %v840_v7  ;;  %v821_v21 = vmul.f32 %v817_v12, %v817_v12  ;;  %v2818_v7 = vld [vmem:[%s2684_s9] sm:$0xff] }
 0x133   : > { %v867_v27 = vmul.f32 %v863_v19, %v863_v19  ;;  %v1090_v19 = vand.u32 2147483647, %v1086_v38  ;;  %v1106_v23 = vsub.f32 %v2711_v1, %v2818_v7  ;;  %v2850_v38 = vld [vmem:[%s2677_s2 + $0x18] sm:$0xff]  ;;  %p3095_p11 = scmp.ne.s32.totalorder %s3092_s19, 0 }
 0x134   : > { %v800_v24 = vadd.f32 %v799_v17, %v798_v16  ;;  %v846_v25 = vadd.f32 %v845_v20, %v844_v18  ;;  %v2749_v26 = vadd.f32 %v822_v22, %v821_v21  ;;  %v2826_v16 = vld [vmem:[%s2677_s2 + $0x10] sm:$0xff] }
 0x135   : > { %v2756_v31 = vadd.f32 %v868_v28, %v867_v27  ;;  %v1088_v27 = vsub.f32 %v2707_v0, %v2826_v16  ;;  %p2077_p9 = pnand %p2076_p5, %p3095_p11 }
 0x136   : > { %1737 = vrsqrt.f32 %v800_v24  ;;  %vm803_vm1 = vcmp.eq.f32.partialorder %v800_v24, inf  ;;  %vm805_vm2 = vcmp.eq.f32.partialorder %v800_v24, 0.0  ;;  %v806_v41 = vand.u32 2147483648, %v800_v24 }
 0x137   : > { %1739 = vrsqrt.f32 %v846_v25  ;;  %vm849_vm3 = vcmp.eq.f32.partialorder %v846_v25, inf  ;;  %vm851_vm4 = vcmp.eq.f32.partialorder %v846_v25, 0.0  ;;  %v852_v42 = vand.u32 2147483648, %v846_v25  ;;  %p2078_p3 = pneg %p2077_p9 }
 0x138   : > { %1741 = vrsqrt.f32 %v2749_v26  ;;  %vm826_vm5 = vcmp.eq.f32.partialorder %v2749_v26, inf  ;;  %vm828_vm6 = vcmp.eq.f32.partialorder %v2749_v26, 0.0  ;;  %v829_v50 = vand.u32 2147483648, %v2749_v26 }
 0x139   : > { %1743 = vrsqrt.f32 %v2756_v31  ;;  %vm872_vm7 = vcmp.eq.f32.partialorder %v2756_v31, inf  ;;  %vm874_vm8 = vcmp.eq.f32.partialorder %v2756_v31, 0.0  ;;  %v875_v55 = vand.u32 2147483648, %v2756_v31 }
 0x13a   : > { %1745 = vrcp.f32 %v2752_v29 }
 0x13b   : > { %1747 = vlog2.f32 %v1074_v35 }
 0x13c   : > { %1749 = vrcp.f32 %v2762_v32 }
 0x13d   : > { %1751 = vrcp.f32 %v2765_v33 }
 0x13e   : > { %1753 = vlog2.f32 %v1076_v45 }
 0x13f   : > { %1755 = vrcp.f32 %v2779_v39 }
 0x140   : > { %v1738_v44 = vpop.eup %1737  ;;  %1757 = vrcp.f32 %v2774_v37 }
 0x141   : > { %v1740_v48 = vpop.eup %1739  ;;  %v802_v49 = vmul.f32 %v1738_v44, %v800_v24  ;;  %1759 = vlog2.f32 %v1077_v58 }
 0x142   : > { %v1742_v52 = vpop.eup %1741  ;;  %v848_v54 = vmul.f32 %v1740_v48, %v846_v25  ;;  %1761 = vlog2.f32 %v1075_v61  ;;  %v1092_v48 = vand.u32 2147483647, %v1088_v27 }
 0x143   : > { %v804_v56 = vsel %vm803_vm1, %v800_v24, %v802_v49  ;;  %v825_v57 = vmul.f32 %v1742_v52, %v2749_v26  ;;  %v1744_v62 = vpop.eup %1743  ;;  %1763 = vrcp.f32 %v2782_v40  ;;  %v2860_v49 = vld [vmem:[%s2684_s9 + $0x18] sm:$0xff] }
 0x144   : > { %v807_v59 = vsel %vm805_vm2, %v806_v41, %v804_v56  ;;  %v850_v60 = vsel %vm849_vm3, %v846_v25, %v848_v54  ;;  %v871_v13 = vmul.f32 %v1744_v62, %v2756_v31  ;;  %v1746_v20 = vpop.eup %1745  ;;  %1765 = vrcp.f32 %v2789_v46 }
 0x145   : > { %v808_v63 = vmul.f32 %v807_v59, %v2800_v53  ;;  %v853_v5 = vsel %vm851_vm4, %v852_v42, %v850_v60  ;;  %v827_v6 = vsel %vm826_vm5, %v2749_v26, %v825_v57  ;;  %v2841_v26 = vld [vmem:[%s2684_s9 + $0x10] sm:$0xff]  ;;  %v1748_v28 = vpop.eup %1747  ;;  %v1110_v42 = vand.u32 2147483647, %v1106_v23 }
 0x146   : > { %v854_v11 = vmul.f32 %v853_v5, %v2800_v53  ;;  %v830_v12 = vsel %vm828_vm6, %v829_v50, %v827_v6  ;;  %v873_v22 = vsel %vm872_vm7, %v2756_v31, %v871_v13  ;;  %v1750_v35 = vpop.eup %1749  ;;  %v2853_v31 = vld [vmem:[%s2677_s2 + $0x8] sm:$0xff]  ;;  %v1108_v43 = vsub.f32 %v2711_v1, %v2841_v26 }
 0x147   : > { %v810_v17 = vsel %vm809_vm0, %v808_v63, 0.0  ;;  %v831_v18 = vmul.f32 %v830_v12, %v2800_v53  ;;  %v876_v25 = vsel %vm874_vm8, %v875_v55, %v873_v22  ;;  %v1752_v44 = vpop.eup %1751  ;;  %v1079_v45 = vmul.f32 0.6931472, %v1748_v28  ;;  %v2863_v50 = vld [vmem:[%s2684_s9 + $0x8] sm:$0xff]  ;;  %s2173_s9 = smov 1.0  }
 0x148   : > { %811 = vadd.xlane.f32.xlu0 %v810_v17  ;;  %v855_v21 = vsel %vm809_vm0, %v854_v11, 0.0  ;;  %v877_v30 = vmul.f32 %v876_v25, %v2800_v53  ;;  %v1095_v47 = vmul.f32 %v1746_v20, %v1090_v19  ;;  %1767 = vrcp.f32 %v2796_v51  ;;  %v1754_v52 = vpop.eup %1753 }
 0x149   : > { %856 = vadd.xlane.f32.xlu1 %v855_v21  ;;  %v832_v24 = vsel %vm809_vm0, %v831_v18, 0.0  ;;  %v1089_v54 = vsub.f32 %v2707_v0, %v2850_v38  ;;  %v1087_v55 = vsub.f32 %v2707_v0, %v2853_v31  ;;  %v1756_v56 = vpop.eup %1755  ;;  %v1112_v58 = vand.u32 2147483647, %v1108_v43 }
 0x14a   : > { %v878_v41 = vsel %vm809_vm0, %v877_v30, 0.0  ;;  %v1758_v57 = vpop.eup %1757  ;;  %v1109_v59 = vsub.f32 %v2711_v1, %v2860_v49  ;;  %v1107_v60 = vsub.f32 %v2711_v1, %v2863_v50  ;;  %v1102_v62 = vadd.f32 %v1095_v47, %v1079_v45 }
 0x14b   : > { %v1760_v61 = vpop.eup %1759  ;;  %v1115_v63 = vmul.f32 %v1750_v35, %v1110_v42  ;;  %v1083_v5 = vmul.f32 0.6931472, %v1754_v52  ;;  %v1099_v6 = vmul.f32 %v1752_v44, %v1092_v48  ;;  %v1093_v12 = vand.u32 2147483647, %v1089_v54 }
 0x14c   : > { %833 = vadd.xlane.f32.xlu0 %v832_v24  ;;  %v1762_v11 = vpop.eup %1761  ;;  %v1091_v13 = vand.u32 2147483647, %v1087_v55  ;;  %v1113_v18 = vand.u32 2147483647, %v1109_v59  ;;  %v1119_v21 = vmul.f32 %v1756_v56, %v1112_v58  ;;  %v1111_v22 = vand.u32 2147483647, %v1107_v60 }
 0x14d   : > { %879 = vadd.xlane.f32.xlu1 %v878_v41  ;;  %v1764_v17 = vpop.eup %1763  ;;  %v1122_v19 = vadd.f32 %v1115_v63, %v1102_v62  ;;  %v1104_v20 = vadd.f32 %v1099_v6, %v1083_v5  ;;  %v1085_v24 = vmul.f32 0.6931472, %v1760_v61  ;;  %v1101_v25 = vmul.f32 %v1758_v57, %v1093_v12  ;;  %v890_v12 = vld [vmem:[%s2674_s28] sm:$0xff] }
 0x14e   : > { %v1766_v23 = vpop.eup %1765  ;;  %v1081_v27 = vmul.f32 0.6931472, %v1762_v11  ;;  %v1097_v28 = vmul.f32 %v1764_v17, %v1091_v13  ;;  %v1005_v55 = vsel %vm809_vm0, %v2800_v53, 0.0  ;;  %v2171_v61 = vmov 0   ;;  %v888_v11 = vld [vmem:[%s2667_s0] sm:$0xff]  ;;  %v1601_v17 = vld [vmem:[%s2667_s0 + $0x8] sm:$0xff] }
 0x14f   : > { %v1124_v35 = vadd.f32 %v1119_v21, %v1104_v20  ;;  %v1105_v41 = vadd.f32 %v1101_v25, %v1085_v24  ;;  %v1121_v42 = vmul.f32 %v1766_v23, %v1113_v18  ;;  %v1602_v18 = vld [vmem:[%s2674_s28 + $0x8] sm:$0xff]  ;;  %v1604_v20 = vld [vmem:[%s2674_s28 + $0x10] sm:$0xff]  ;;  %v1605_v24 = vld [vmem:[%s2667_s0 + $0x18] sm:$0xff]  ;;  %vm1015_vm2 = vcmask 7168  }
 0x150   : > { %1010 = vmax.xlane.f32.xlu0 %v1009_v36  ;;  %v1126_v36 = vmul.f32 %v1122_v19, %v2800_v53  ;;  %v1103_v43 = vadd.f32 %v1097_v28, %v1081_v27  ;;  %v1603_v19 = vld [vmem:[%s2667_s0 + $0x10] sm:$0xff]  ;;  %v1606_v28 = vld [vmem:[%s2674_s28 + $0x18] sm:$0xff]  ;;  %s3091_s0 = sld [smem:[#allocation36_spill]] }
 0x151   : > { %v1128_v45 = vmul.f32 %v1124_v35, %v2800_v53  ;;  %v1125_v47 = vadd.f32 %v1121_v42, %v1105_v41 }
 0x152   : > { %v1768_v30 = vpop.eup %1767 }
 0x153   : > { %v1117_v44 = vmul.f32 %v1768_v30, %v1111_v22  ;;  %v1129_v52 = vmul.f32 %v1125_v47, %v2800_v53 }
 0x155   : > { %v1123_v48 = vadd.f32 %v1117_v44, %v1103_v43 }
 0x156   : > { %s790_s28 = scalar_lea.vmem %s3091_s0, %s1631_s5  ;;  %s1260_s0 = scalar_lea.sflag [#allocation4], %s2643_s26 }
 0x157   : > { %v1127_v54 = vmul.f32 %v1123_v48, %v2800_v53 }
 0x15e   : > { %1171 = vrot.lane.b32.xlu1 %v1126_v36, %s2170_s21 }
 0x162   : > { %1175 = vrot.lane.b32.xlu1 %v1128_v45, %s2170_s21 }
 0x166   : > { %1177 = vrot.lane.b32.xlu1 %v1129_v52, %s2170_s21  ;;  %1173 = vrot.lane.b32.xlu0 %v1127_v54, %s2170_s21 }
 0x18a   : > { %1006 = vadd.xlane.f32.xlu1 %v1005_v55 }
 0x19b   : > { %1228 = vrot.lane.b32.xlu1 %v2800_v53, %s2170_s21  ;;  %s3093_s21 = sld [smem:[#allocation37_spill]] }
 0x1a1   : > { %s3094_s30 = smov %s3093_s21  ;;  %s2984_s29 = scalar_lea.hbm %s3093_s21, %s1621_s20 }
 0x1d5   : > { %v812_v56 = vpop.xlane.xlu0 %811 }
 0x1d6   : > { %vm813_vm9 = vcmp.lt.f32.partialorder %v812_v56, inf  ;;  %v857_v57 = vpop.xlane.xlu1 %856 }
 0x1d7   : > { %v814_v58 = vsel %vm813_vm9, %v812_v56, inf }
 0x1d9   : > { %v834_v59 = vpop.xlane.xlu0 %833 }
 0x1da   : > { %vm835_vm10 = vcmp.lt.f32.partialorder %v834_v59, %v814_v58  ;;  %v880_v63 = vpop.xlane.xlu1 %879 }
 0x1db   : > { %v836_v60 = vsel %vm835_vm10, %v834_v59, %v814_v58  ;;  %v837_v62 = vsel %vm835_vm10, 1, %v2171_v61 }
 0x1dc   : > { %vm858_vm11 = vcmp.lt.f32.partialorder %v857_v57, %v836_v60 }
 0x1dd   : > { %v859_v5 = vsel %vm858_vm11, %v857_v57, %v836_v60  ;;  %v860_v6 = vsel %vm858_vm11, 2, %v837_v62 }
 0x1de   : > { %vm881_vm12 = vcmp.lt.f32.partialorder %v880_v63, %v859_v5 }
 0x1df   : > { %v882_v13 = vsel %vm881_vm12, 3, %v860_v6 }
 0x1e0   : > { %vm883_vm13 = vcmp.eq.s32.totalorder %v882_v13, 0  ;;  %vm892_vm14 = vcmp.eq.s32.totalorder %v882_v13, 1  ;;  %vm903_vm15 = vcmp.eq.s32.totalorder %v882_v13, 2  ;;  %vm914_vm1 = vcmp.eq.s32.totalorder %v882_v13, 3 }
 0x1e1   : > { %v886_v21 = vsel %vm883_vm13, %v2713_v2, 0.0  ;;  %v889_v22 = vsel %vm883_vm13, %v888_v11, 1.0  ;;  %v891_v23 = vsel %vm883_vm13, %v890_v12, 1.0  ;;  %v887_v30 = vsel %vm883_vm13, %v2716_v3, 0.0 }
 0x1e2   : > { %v899_v25 = vsel %vm892_vm14, %v1601_v17, %v889_v22  ;;  %v902_v27 = vsel %vm892_vm14, %v1602_v18, %v891_v23  ;;  %v895_v2 = vsel %vm892_vm14, %v2729_v9, %v886_v21  ;;  %v896_v44 = vsel %vm892_vm14, %v2732_v10, %v887_v30  ;;  %v1131_v22 = vld [vmem:[%s790_s28 + $0x8] sm:$0xff]  ;;  %v1132_v23 = vld [vmem:[%s790_s28 + $0x10] sm:$0xff] }
 0x1e3   : > { %v910_v36 = vsel %vm903_vm15, %v1603_v19, %v899_v25  ;;  %v913_v35 = vsel %vm903_vm15, %v1604_v20, %v902_v27  ;;  %v948_v45 = vsel %vm883_vm13, %v2752_v29, 1.0  ;;  %v906_v3 = vsel %vm903_vm15, %v2718_v4, %v895_v2  ;;  %v1011_v25 = vpop.xlane.xlu0 %1010 }
 0x1e4   : > { %v921_v41 = vsel %vm914_vm1, %v1605_v24, %v910_v36  ;;  %v924_v42 = vsel %vm914_vm1, %v1606_v28, %v913_v35  ;;  %v950_v48 = vsel %vm883_vm13, %v2762_v32, 1.0  ;;  %v944_v9 = vsel %vm883_vm13, %v2768_v34, 0.0  ;;  %v1133_v24 = vld [vmem:[%s790_s28 + $0x18] sm:$0xff] }
 0x1e5   : > { %v925_v43 = vmul.f32 4.0, %v921_v41  ;;  %1769 = vrcp.f32 %v921_v41  ;;  %v959_v52 = vsel %vm892_vm14, %v2782_v40, %v948_v45  ;;  %v962_v10 = vsel %vm892_vm14, %v2796_v51, %v950_v48 }
 0x1e6   : > { %1771 = vrcp.f32 %v924_v42  ;;  %v971_v29 = vsel %vm903_vm15, %v2765_v33, %v959_v52  ;;  %v907_v4 = vsel %vm903_vm15, %v2727_v8, %v896_v44  ;;  %v946_v32 = vsel %vm883_vm13, %v2818_v7, 0.0 }
 0x1e7   : > { %v926_v47 = vmul.f32 %v925_v43, %v924_v42  ;;  %v974_v54 = vsel %vm903_vm15, %v2779_v39, %v962_v10  ;;  %v983_v34 = vsel %vm914_vm1, %v2774_v37, %v971_v29  ;;  %v917_v40 = vsel %vm914_vm1, %v2740_v14, %v906_v3 }
 0x1e8   : > { %v953_v51 = vsel %vm892_vm14, %v2853_v31, %v944_v9  ;;  %v986_v33 = vsel %vm914_vm1, %v2789_v46, %v974_v54  ;;  %v987_v55 = vmul.f32 4.0, %v983_v34  ;;  %v918_v8 = vsel %vm914_vm1, %v2743_v15, %v907_v4 }
 0x1e9   : > { %1773 = vlog2.f32 %v926_v47  ;;  %v956_v7 = vsel %vm892_vm14, %v2863_v50, %v946_v32  ;;  %v929_v37 = vsub.f32 %v2707_v0, %v917_v40  ;;  %v965_v14 = vsel %vm903_vm15, %v2826_v16, %v953_v51 }
 0x1ea   : > { %v988_v39 = vmul.f32 %v987_v55, %v986_v33  ;;  %1775 = vrcp.f32 %v983_v34  ;;  %v934_v31 = vsub.f32 %v2711_v1, %v918_v8  ;;  %v968_v46 = vsel %vm903_vm15, %v2841_v26, %v956_v7 }
 0x1eb   : > { %1777 = vrcp.f32 %v986_v33  ;;  %v977_v15 = vsel %vm914_vm1, %v2850_v38, %v965_v14  ;;  %v930_v50 = vand.u32 2147483647, %v929_v37  ;;  %v980_v59 = vsel %vm914_vm1, %v2860_v49, %v968_v46  ;;  %v1172_v46 = vpop.permute.xlu1 %1171 }
 0x1ec   : > { %1779 = vlog2.f32 %v988_v39  ;;  %v935_v61 = vand.u32 2147483647, %v934_v31  ;;  %v991_v62 = vsub.f32 %v2707_v0, %v977_v15  ;;  %v996_v26 = vsub.f32 %v2711_v1, %v980_v59  ;;  %v1130_v1 = vld [vmem:[%s790_s28] sm:$0xff]  ;;  %s2079_s28 = sshll.u32 %s2174_s14, 4  ;;  %s2080_s28 = int_to_ptr.vmem [resolvable:$false] %s2079_s28 }
 0x1ed   : > { %vm1012_vm3 = vcmp.gt.f32.partialorder %v1011_v25, 0.0  ;;  %v1134_v28 = vsel %vm1015_vm2, %v1130_v1, -inf  ;;  %v1135_v36 = vsel %vm1015_vm2, %v1131_v22, -inf  ;;  %v1136_v35 = vsel %vm1015_vm2, %v1132_v23, -inf  ;;  %p2082_p12 = scmp.lt.s32.totalorder %s2986_s11, %s2080_s28 }
 0x1ee   : > { %v992_v38 = vand.u32 2147483647, %v991_v62  ;;  %v997_v19 = vand.u32 2147483647, %v996_v26  ;;  %v1137_v2 = vsel %vm1015_vm2, %v1133_v24, -inf  ;;  %v2172_v41 = vmov 0.0  }
 0x1ef   : > { %v1770_v56 = vpop.eup %1769  ;;  %v1619_v42 = vsel %vm1012_vm3, 1.0, %v2172_v41  ;;  %v1138_v44 = vmax.f32 %v1134_v28, %v1135_v36  ;;  %v1139_v45 = vmax.f32 %v1136_v35, %v1137_v2  ;;  %v1176_v15 = vpop.permute.xlu1 %1175 }
 0x1f0   : > { %v1772_v57 = vpop.eup %1771  ;;  %v932_v16 = vmul.f32 %v1770_v56, %v930_v50  ;;  %v1016_v3 = vsel %vm1015_vm2, %v1619_v42, 0.0 }
 0x1f1   : > { %v937_v5 = vmul.f32 %v1772_v57, %v935_v61  ;;  %v1140_v47 = vmax.f32 %v1138_v44, %v1139_v45  ;;  %v1174_v61 = vpop.permute.xlu0 %1173 }
 0x1f3   : > { %v1774_v58 = vpop.eup %1773  ;;  %v1141_v48 = vsub.f32 %v1130_v1, %v1140_v47  ;;  %v1142_v9 = vsub.f32 %v1131_v22, %v1140_v47  ;;  %v1143_v52 = vsub.f32 %v1132_v23, %v1140_v47  ;;  %v1144_v29 = vsub.f32 %v1133_v24, %v1140_v47 }
 0x1f4   : > { %v928_v60 = vmul.f32 0.6931472, %v1774_v58  ;;  %v1776_v6 = vpop.eup %1775 }
 0x1f5   : > { %v1778_v11 = vpop.eup %1777  ;;  %v994_v18 = vmul.f32 %v1776_v6, %v992_v38  ;;  %v1147_v10 = vmul.f32 1.442695, %v1142_v9  ;;  %v1149_v4 = vmul.f32 1.442695, %v1143_v52  ;;  %v1151_v32 = vmul.f32 1.442695, %v1144_v29 }
 0x1f6   : > { %v933_v63 = vadd.f32 %v932_v16, %v928_v60  ;;  %v1780_v17 = vpop.eup %1779  ;;  %v999_v21 = vmul.f32 %v1778_v11, %v997_v19  ;;  %v1178_v16 = vpop.permute.xlu1 %1177 }
 0x1f7   : > { %v990_v13 = vmul.f32 0.6931472, %v1780_v17 }
 0x1f8   : > { %v938_v12 = vadd.f32 %v937_v5, %v933_v63 }
 0x1f9   : > { %v995_v20 = vadd.f32 %v994_v18, %v990_v13 }
 0x1fa   : > { %v939_v49 = vmul.f32 %v938_v12, %v2800_v53 }
 0x1fb   : > { %v1000_v27 = vadd.f32 %v999_v21, %v995_v20 }
 0x1fc   : > { %v940_v0 = vsel %vm809_vm0, %v939_v49, 0.0 }
 0x1fd   : > { %941 = vadd.xlane.f32.xlu0 %v940_v0  ;;  %v1001_v30 = vmul.f32 %v1000_v27, %v2800_v53  ;;  %v1145_v53 = vmul.f32 1.442695, %v1141_v48 }
 0x1ff   : > { %v1002_v43 = vsel %vm809_vm0, %v1001_v30, 0.0  ;;  %1781 = vpow2.f32 %v1145_v53 }
 0x200   : > { %1783 = vpow2.f32 %v1147_v10 }
 0x201   : > { %1003 = vadd.xlane.f32.xlu0 %v1002_v43  ;;  %1785 = vpow2.f32 %v1149_v4 }
 0x202   : > { %1787 = vpow2.f32 %v1151_v32 }
 0x205   : > { %1017 = vadd.xlane.f32.xlu0 %v1016_v3 }
 0x209   : > { %v1782_v54 = vpop.eup %1781 }
 0x20a   : > { %v1784_v34 = vpop.eup %1783  ;;  %v1153_v40 = vsel %vm1015_vm2, %v1782_v54, 0.0 }
 0x20b   : > { %v1154_v51 = vsel %vm1015_vm2, %v1784_v34, 0.0  ;;  %v1786_v33 = vpop.eup %1785 }
 0x20c   : > { %v1155_v55 = vadd.f32 %v1154_v51, %v1153_v40  ;;  %v1156_v8 = vsel %vm1015_vm2, %v1786_v33, 0.0  ;;  %v1788_v7 = vpop.eup %1787 }
 0x20d   : > { %v1158_v37 = vsel %vm1015_vm2, %v1788_v7, 0.0 }
 0x20e   : > { %v1157_v39 = vadd.f32 %v1156_v8, %v1155_v55 }
 0x210   : > { %v1159_v14 = vadd.f32 %v1158_v37, %v1157_v39 }
 0x212   : > { %1789 = vlog2.f32 %v1159_v14 }
 0x217   : > { %v1007_v43 = vpop.xlane.xlu1 %1006 }
 0x218   : > { %v1008_v45 = vmax.f32 %v1007_v43, 1.0 }
 0x21b   : > { %v1229_v51 = vpop.permute.xlu1 %1228 }
 0x21c   : > { %v1790_v31 = vpop.eup %1789  ;;  %v1231_v8 = vsel %vm1015_vm2, %v1229_v51, 0.0 }
 0x21d   : > { %v1161_v56 = vmul.f32 0.6931472, %v1790_v31 }
 0x21f   : > { %v1162_v57 = vadd.f32 %v1161_v56, %v1140_v47 }
 0x221   : > { %v1163_v50 = vsub.f32 %v1130_v1, %v1162_v57  ;;  %v1165_v58 = vsub.f32 %v1132_v23, %v1162_v57  ;;  %v1166_v59 = vsub.f32 %v1133_v24, %v1162_v57  ;;  %v1164_v60 = vsub.f32 %v1131_v22, %v1162_v57 }
 0x223   : > { %v1183_v62 = vsub.f32 %v1163_v50, %v1172_v46  ;;  %v1185_v63 = vsub.f32 %v1165_v58, %v1176_v15  ;;  %v1186_v5 = vsub.f32 %v1166_v59, %v1178_v16  ;;  %v1184_v26 = vsub.f32 %v1164_v60, %v1174_v61 }
 0x225   : > { %v1187_v6 = vsel %vm1015_vm2, %v1183_v62, -inf  ;;  %v1189_v11 = vsel %vm1015_vm2, %v1185_v63, -inf  ;;  %v1190_v12 = vsel %vm1015_vm2, %v1186_v5, -inf  ;;  %v1188_v38 = vsel %vm1015_vm2, %v1184_v26, -inf }
 0x226   : > { %v1192_v17 = vmax.f32 %v1189_v11, %v1190_v12  ;;  %v1191_v49 = vmax.f32 %v1187_v6, %v1188_v38 }
 0x228   : > { %v1193_v13 = vmax.f32 %v1191_v49, %v1192_v17 }
 0x22a   : > { %v1194_v18 = vsub.f32 %v1183_v62, %v1193_v13  ;;  %v1195_v19 = vsub.f32 %v1184_v26, %v1193_v13  ;;  %v1196_v20 = vsub.f32 %v1185_v63, %v1193_v13  ;;  %v1197_v1 = vsub.f32 %v1186_v5, %v1193_v13 }
 0x22c   : > { %v1198_v0 = vmul.f32 1.442695, %v1194_v18  ;;  %v1200_v21 = vmul.f32 1.442695, %v1195_v19  ;;  %v1202_v22 = vmul.f32 1.442695, %v1196_v20 }
 0x22d   : > { %v1204_v23 = vmul.f32 1.442695, %v1197_v1 }
 0x22e   : > { %1791 = vpow2.f32 %v1198_v0 }
 0x22f   : > { %1793 = vpow2.f32 %v1200_v21 }
 0x230   : > { %1795 = vpow2.f32 %v1202_v22 }
 0x231   : > { %1797 = vpow2.f32 %v1204_v23 }
 0x238   : > { %v1792_v24 = vpop.eup %1791 }
 0x239   : > { %v1794_v25 = vpop.eup %1793  ;;  %v1206_v27 = vsel %vm1015_vm2, %v1792_v24, 0.0  ;;  %v1241_v24 = vlaneseq }
 0x23a   : > { %v1207_v28 = vsel %vm1015_vm2, %v1794_v25, 0.0  ;;  %v1796_v30 = vpop.eup %1795 }
 0x23b   : > { %v1208_v36 = vadd.f32 %v1207_v28, %v1206_v27  ;;  %v1209_v35 = vsel %vm1015_vm2, %v1796_v30, 0.0  ;;  %v1798_v2 = vpop.eup %1797  ;;  %v1242_v25 = vand.u32 127, %v1241_v24 }
 0x23c   : > { %v1211_v42 = vsel %vm1015_vm2, %v1798_v2, 0.0 }
 0x23d   : > { %v1210_v41 = vadd.f32 %v1209_v35, %v1208_v36  ;;  %vm1243_vm0 = vcmp.eq.s32.totalorder %v1242_v25, 0  ;;  %vm1246_vm4 = vcmp.eq.s32.totalorder %v1242_v25, 1  ;;  %vm1250_vm5 = vcmp.eq.s32.totalorder %v1242_v25, 2 }
 0x23e   : > { %vm1254_vm6 = vcmp.eq.s32.totalorder %v1242_v25, 3 }
 0x23f   : > { %v1212_v44 = vadd.f32 %v1211_v42, %v1210_v41 }
 0x241   : > { %1799 = vlog2.f32 %v1212_v44 }
 0x242   : > { %1801 = vrcp.f32 %v1008_v45 }
 0x24b   : > { %v1800_v3 = vpop.eup %1799 }
 0x24c   : > { %v1802_v47 = vpop.eup %1801  ;;  %v1214_v53 = vmul.f32 0.6931472, %v1800_v3 }
 0x24e   : > { %v1215_v10 = vadd.f32 %v1214_v53, %v1193_v13 }
 0x250   : > { %v1216_v54 = vsub.f32 0.0, %v1215_v10 }
 0x252   : > { %v1217_v33 = vsel %vm1015_vm2, %v1216_v54, 0.0 }
 0x28a   : > { %v942_v48 = vpop.xlane.xlu0 %941 }
 0x28b   : > { %v1028_v9 = vmul.f32 %v1802_v47, %v942_v48 }
 0x28d   : > { %v1029_v52 = vsel %vm1015_vm2, %v1028_v9, 0.0 }
 0x28e   : > { %1030 = vadd.xlane.f32.xlu0 %v1029_v52  ;;  %v1004_v29 = vpop.xlane.xlu0 %1003 }
 0x28f   : > { %v1043_v4 = vmul.f32 %v1802_v47, %v1004_v29 }
 0x291   : > { %v1044_v32 = vsel %vm1015_vm2, %v1043_v4, 0.0 }
 0x292   : > { %1045 = vadd.xlane.f32.xlu0 %v1044_v32  ;;  %v1018_v34 = vpop.xlane.xlu0 %1017 }
 0x293   : > { %v1019_v40 = vrot.slane %v1018_v34, 4 }
 0x295   : > { %v1020_v55 = vadd.f32 %v1019_v40, %v1018_v34 }
 0x296   : > { %1218 = vadd.xlane.f32.xlu0 %v1217_v33 }
 0x297   : > { %v1021_v7 = vrot.slane %v1020_v55, 2 }
 0x299   : > { %v1022_v39 = vadd.f32 %v1021_v7, %v1020_v55 }
 0x29a   : > { %1232 = vadd.xlane.f32.xlu0 %v1231_v8 }
 0x29b   : > { %v1023_v37 = vrot.slane %v1022_v39, 1 }
 0x29d   : > { %v1024_v14 = vadd.f32 %v1023_v37, %v1022_v39 }
 0x29f   : > { %1633 = vpush %v1024_v14 }
 0x2d0   : > { %s1634_s2 = spop %1633 }
 0x2d1   : > { %s1026_s17 = smax.f32 %s2173_s9, %s1634_s2  ;;  %s2081_s2 = scalar_lea.vmem %s2080_s28, 256 }
 0x2d2   : > { %v1039_v31 = vstv %s1026_s17  ;;  %p2083_p6 = scmp.lt.s32.totalorder %s2081_s2, %s2075_s25 }
 0x2d3   : > { %1803 = vrcp.f32 %v1039_v31 }
 0x2d4   : > { %p2084_p8 = por %p2083_p6, %p2082_p12 }
 0x2d6   : > { %p2085_p10 = pnand %p2084_p8, %p2078_p3 }
 0x2dd   : > { %v1804_v62 = vpop.eup %1803 }
 0x31b   : > { %v1031_v46 = vpop.xlane.xlu0 %1030 }
 0x31c   : > { %v1032_v56 = vrot.slane %v1031_v46, 4 }
 0x31e   : > { %v1033_v15 = vadd.f32 %v1032_v56, %v1031_v46 }
 0x31f   : > { %v1046_v50 = vpop.xlane.xlu0 %1045 }
 0x320   : > { %v1034_v57 = vrot.slane %v1033_v15, 2  ;;  %v1047_v58 = vrot.slane %v1046_v50, 4 }
 0x322   : > { %v1035_v59 = vadd.f32 %v1034_v57, %v1033_v15  ;;  %v1048_v60 = vadd.f32 %v1047_v58, %v1046_v50 }
 0x323   : > { %v1219_v61 = vpop.xlane.xlu0 %1218 }
 0x324   : > { %v1036_v16 = vrot.slane %v1035_v59, 1  ;;  %v1049_v63 = vrot.slane %v1048_v60, 2  ;;  %v1220_v5 = vrot.slane %v1219_v61, 4 }
 0x326   : > { %v1037_v26 = vadd.f32 %v1036_v16, %v1035_v59  ;;  %v1221_v6 = vadd.f32 %v1220_v5, %v1219_v61  ;;  %v1050_v11 = vadd.f32 %v1049_v63, %v1048_v60 }
 0x327   : > { %v1233_v12 = vpop.xlane.xlu0 %1232 }
 0x328   : > { %1635 = vpush %v1037_v26  ;;  %v1222_v38 = vrot.slane %v1221_v6, 2  ;;  %v1234_v17 = vrot.slane %v1233_v12, 4  ;;  %v1051_v49 = vrot.slane %v1050_v11, 1 }
 0x329   : > { %1637 = vpush %v1804_v62 }
 0x32a   : > { %v1235_v13 = vadd.f32 %v1234_v17, %v1233_v12  ;;  %v1052_v18 = vadd.f32 %v1051_v49, %v1050_v11  ;;  %v1223_v19 = vadd.f32 %v1222_v38, %v1221_v6 }
 0x32c   : > { %v1236_v0 = vrot.slane %v1235_v13, 2  ;;  %1639 = vpush %v1052_v18  ;;  %v1224_v20 = vrot.slane %v1223_v19, 1 }
 0x32e   : > { %v1237_v21 = vadd.f32 %v1236_v0, %v1235_v13  ;;  %v1225_v1 = vadd.f32 %v1224_v20, %v1223_v19 }
 0x330   : > { %1641 = vpush %v1225_v1  ;;  %v1238_v22 = vrot.slane %v1237_v21, 1 }
 0x332   : > { %v1239_v23 = vadd.f32 %v1238_v22, %v1237_v21 }
 0x334   : > { %1643 = vpush %v1239_v23 }
 0x359   : > { %s1636_s18 = spop %1635 }
 0x35a   : > { %s1638_s27 = spop %1637 }
 0x35b   : > { %s1042_s23 = smul.f32 %s1638_s27, %s1636_s18 }
 0x35d   : > { %s1640_s5 = spop %1639  ;;  %v1244_v27 = vstv %s1042_s23 }
 0x35e   : > { %s1057_s7 = smul.f32 %s1640_s5, %s1638_s27  ;;  %v1245_v30 = vsel %vm1243_vm0, %v1244_v27, 0.0 }
 0x360   : > { %v1247_v28 = vstv %s1057_s7 }
 0x361   : > { %v1248_v36 = vsel %vm1246_vm4, %v1247_v28, 0.0  ;;  %s1642_s16 = spop %1641 }
 0x362   : > { %v1249_v35 = vadd.f32 %v1248_v36, %v1245_v30  ;;  %v1251_v2 = vstv %s1642_s16 }
 0x363   : > { %v1252_v41 = vsel %vm1250_vm5, %v1251_v2, 0.0 }
 0x364   : > { %v1253_v42 = vadd.f32 %v1252_v41, %v1249_v35 }
 0x365   : > { %s1644_s13 = spop %1643 }
 0x366   : > { %v1255_v43 = vstv %s1644_s13 }
 0x367   : > { %v1256_v44 = vsel %vm1254_vm6, %v1255_v43, 0.0 }
 0x368   : > { %v1257_v45 = vadd.f32 %v1256_v44, %v1253_v42 }
 0x36a   : > { %1258 = vst [vmem:[%s776_s15] sm:$0xff] %v1257_v45 }
 0x36b   : > { %2088 = shalt.err (!%p2085_p10)
}
 0x36c   : > { %s2089_s26 = scalar_lea.hbm %s2984_s29, 128  ;;  %s2093_s18 = scalar_lea.hbm %s3094_s30, 256 }
 0x36d   : > { %p2090_p7 = scmp.ne.s32.totalorder %s2984_s29, %s2089_s26  ;;  %p2094_p1 = scmp.lt.u32.totalorder %s2984_s29, %s3094_s30 }
 0x36e   : > { %p2095_p4 = scmp.lt.u32.totalorder %s2093_s18, %s2089_s26  ;;  %p2097_p5 = scmp.lt.u32.totalorder %s2089_s26, %s2984_s29 }
 0x36f   : > { %p2091_p0 = pnand %p2090_p7, %p3095_p11 }
 0x370   : > { %p2096_p13 = por %p2095_p4, %p2094_p1 }
 0x371   : > { %p2092_p2 = pneg %p2091_p0 }
 0x372   : > { %p2098_p9 = por %p2097_p5, %p2096_p13 }
 0x374   : > { %p2099_p3 = pnand %p2098_p9, %p2092_p2 }
 0x376   : > { %2102 = shalt.err (!%p2099_p3)
}
 0x377   : > { %1663 = dma.vmem_to_hbm [thread:$0]  (%p3095_p11), %s2986_s11, 128, %s2984_s29, %s1260_s0  }
 0x378 PF: > { %s3096_s5 = sld [smem:[#allocation24_spill]]  ;;  %s3097_s7 = sld [smem:[#allocation29_spill]] }
 0x379   : > { %p3099_p6 = scmp.ge.s32.totalorder %s2157_s24, 2 }
 0x37e   : > { %s1285_s16 = sand.u32 1, %s3096_s5   ;;  %p3098_p12 = scmp.ne.s32.totalorder %s3097_s7, 0 }
 0x37f   : > { %s1286_s20 = scalar_lea.sflag [#allocation4], %s1285_s16 }
 0x380   : > { %p1694_p8 = pnand %p3099_p6, %p3098_p12 }
 0x382   : > { %2140 = dma.done.wait (!%p1694_p8), %s1286_s20, 128  }
 0x383   : > { %2142 = vsyncadd (!%p1694_p8), %s1286_s20, 4294967168  ;;  %s3100_s24 = sld [smem:[#allocation26_spill]]  ;;  %s3101_s13 = sld [smem:[#allocation25_spill]] }
 0x384   : > { %s3102_s23 = sld [smem:[#allocation27_spill]]  ;;  %s3103_s21 = smov %s2149_s22 }
 0x389   : > { %p37_p10 = scmp.ge.s32.totalorder %s3100_s24, 4   ;;  %s3104_s22 = smov %s3101_s13 }
 0x38b   :  { %39 = sbr.rel (!%p37_p10) target bundleno = 22 (0x16), region = 242 }
 0x392   :  { %1291 = vsyncpa [#allocation3], 1 }
 0x393   :  { %1293 = vsyncpa [#allocation3 + $0x1], 1 }
 0x394   :  { %1294 = vsyncpa [#allocation6], 1 }
 0x395   :  { %1296 = vsyncpa [#allocation6 + $0x1], 1 }
 0x396   :  { %1297 = vsyncpa [#allocation9], 1 }
 0x397   :  { %1299 = vsyncpa [#allocation9 + $0x1], 1 }
 0x398   :  { %1300 = vsyncpa [#allocation12], 1 }
 0x399   :  { %1302 = vsyncpa [#allocation12 + $0x1], 1 }
 0x39a   :  { %1303 = vsyncpa [#allocation15], 1 }
 0x39b   :  { %1305 = vsyncpa [#allocation15 + $0x1], 1 }
 0x39c   :  { %1306 = vsyncpa [#allocation4], 1 }
 0x39d   :  { %1308 = vsyncpa [#allocation4 + $0x1], 1 }

</bundles_post_ra>
